<compile_context>
chip_gen: v6e
topology: v6e:2x2x1
jax: 0.10.0
libtpu: 0.0.40
codegen_flags: <defaults>
</compile_context>

<pallas_src>
import functools
import math

import jax
import jax.numpy as jnp
from jax.experimental import pallas as pl
from jax.experimental.pallas import tpu as pltpu

_EPS = 1e-5
_BF16 = jnp.bfloat16


def _round_up(x, m):
    return (x + m - 1) // m * m


def _cdiv(a, b):
    return -(-a // b)


def _next_pow2(x):
    return 1 << max(x - 1, 0).bit_length()


# ---------------------------------------------------------------------------
# Kernels (all operate on the lane-dense packed [TM, L] layout, L = G*Dp).
# Passes 1-3 run on a 2-D grid (core_split, tile); the moment accumulator is
# grid-resident along the trailing "arbitrary" tile axis.
# ---------------------------------------------------------------------------
def _stats12_kernel(hs_ref, ht_ref, w_ref, mom_ref):
    """Pass 1: per-channel sum / sum-of-squares of conv_xs(HS), conv_xt(HT)."""
    @pl.when(pl.program_id(1) == 0)
    def _init():
        mom_ref[...] = jnp.zeros_like(mom_ref)

    t1 = jnp.dot(hs_ref[...], w_ref[0], preferred_element_type=jnp.float32)
    t2 = jnp.dot(ht_ref[...], w_ref[1], preferred_element_type=jnp.float32)
    mom_ref[0:1, :] += jnp.sum(t1, axis=0, keepdims=True)
    mom_ref[1:2, :] += jnp.sum(t1 * t1, axis=0, keepdims=True)
    mom_ref[2:3, :] += jnp.sum(t2, axis=0, keepdims=True)
    mom_ref[3:4, :] += jnp.sum(t2 * t2, axis=0, keepdims=True)


def _gate_stats3_kernel(hs_ref, ht_ref, w_ref, bn_ref, t3_ref, mom_ref):
    """Pass 2: apply BN1/BN2, gate, conv_h1; accumulate BN3 moments."""
    @pl.when(pl.program_id(1) == 0)
    def _init():
        mom_ref[...] = jnp.zeros_like(mom_ref)

    hs = hs_ref[...]                                  # bf16 [TM, L]
    ht = ht_ref[...]
    t1 = jnp.dot(hs, w_ref[0], preferred_element_type=jnp.float32)
    t2 = jnp.dot(ht, w_ref[1], preferred_element_type=jnp.float32)
    xs = t1 * bn_ref[0:1, :] + bn_ref[1:2, :]
    xt = t2 * bn_ref[2:3, :] + bn_ref[3:4, :]
    z = jax.nn.sigmoid(xs + xt)
    h = z * hs.astype(jnp.float32) + (1.0 - z) * ht.astype(jnp.float32)
    t3 = jnp.dot(h.astype(_BF16), w_ref[2], preferred_element_type=jnp.float32)
    # Store t3 in bf16 (halves pass-2 write + pass-3 read); BN3 moments are
    # computed from the f32 t3 so the statistics stay unbiased.
    t3_ref[...] = t3.astype(_BF16)
    mom_ref[0:1, :] += jnp.sum(t3, axis=0, keepdims=True)
    mom_ref[1:2, :] += jnp.sum(t3 * t3, axis=0, keepdims=True)


def _h1_stats4_kernel(t3_ref, w_ref, bn_ref, h1_ref, mom_ref, *,
                      tile_rows, inner_tiles, group, dim, m_real, need_mask):
    """Pass 3: apply BN3 + relu -> h1 (bf16); conv_h2; accumulate BN4 moments."""
    @pl.when(pl.program_id(1) == 0)
    def _init():
        mom_ref[...] = jnp.zeros_like(mom_ref)

    t3 = t3_ref[...].astype(jnp.float32)
    h1 = jnp.maximum(t3 * bn_ref[0:1, :] + bn_ref[1:2, :], 0.0)
    if need_mask:
        # Zero the zero-padded positions so relu(shift3) garbage does not
        # pollute the BN4 batch statistics (padding is static, so this branch
        # is only compiled in when actually needed).
        row = jax.lax.broadcasted_iota(jnp.int32, h1.shape, 0)
        lane = jax.lax.broadcasted_iota(jnp.int32, h1.shape, 1)
        tile = pl.program_id(0) * inner_tiles + pl.program_id(1)
        pos = (tile * tile_rows + row) * group + lane // dim
        h1 = jnp.where(pos < m_real, h1, 0.0)
    h1_bf = h1.astype(_BF16)
    h1_ref[...] = h1_bf
    t4 = jnp.dot(h1_bf, w_ref[...], preferred_element_type=jnp.float32)
    mom_ref[0:1, :] += jnp.sum(t4, axis=0, keepdims=True)
    mom_ref[1:2, :] += jnp.sum(t4 * t4, axis=0, keepdims=True)


def _apply_bn4_kernel(h1_ref, w_ref, bn_ref, out_ref):
    """Pass 4: conv_h2(h1) + BN4 -> output (pure parallel over M tiles)."""
    t4 = jnp.dot(h1_ref[...], w_ref[...], preferred_element_type=jnp.float32)
    out_ref[...] = t4 * bn_ref[0:1, :] + bn_ref[1:2, :]


# ---------------------------------------------------------------------------
# Wrapper
# ---------------------------------------------------------------------------
def gated_fusion_pallas(HS, HT, params, *, max_tile_rows=4096):
    B, T, N, D = HS.shape
    M = B * T * N

    # Lane-dense packing: pad D up to the nearest divisor of 128 (Dp), then
    # fold G = 128 // Dp consecutive positions into the 128-lane axis so all
    # BN / elementwise / store work is lane-dense and the MXU sees K=N=L>=128.
    if D <= 128:
        Dp = _next_pow2(D)
        G = 128 // Dp
    else:
        Dp = _round_up(D, 128)
        G = 1
    L = G * Dp

    Mg = _cdiv(M, G)                               # packed rows
    # Tile selection: spread rows evenly so padding only affects the tail tile.
    n_tiles = _cdiv(Mg, max_tile_rows)
    core_splits = 2 if n_tiles >= 2 else 1         # leading "parallel" axis:
    n_tiles = _round_up(n_tiles, core_splits)      # splits passes 1-3 across
    TM = _round_up(_cdiv(Mg, n_tiles), 16)         # v7x's 2 TCs, harmless on
    Mg_pad = TM * n_tiles                          # 1-TC chips.
    inner = n_tiles // core_splits
    need_mask = (Mg_pad * G) > M

    def pack(x):
        x2 = x.reshape(M, D).astype(_BF16)
        if Dp != D:
            x2 = jnp.pad(x2, ((0, 0), (0, Dp - D)))
        if Mg_pad * G != M:
            x2 = jnp.pad(x2, ((0, Mg_pad * G - M), (0, 0)))
        return x2.reshape(Mg_pad, L)

    hs_p = pack(HS)
    ht_p = pack(HT)

    # Block-diagonal packed weights (bf16 MXU operands).
    eye_g = jnp.eye(G, dtype=jnp.float32)

    def pack_w(w):
        if Dp != D:
            w = jnp.pad(w, ((0, Dp - D), (0, Dp - D)))
        return jnp.kron(eye_g, w)

    w_all = jnp.stack([
        pack_w(params["wxs_t"]),
        pack_w(params["wxt_t"]),
        pack_w(params["wh1_t"]),
        pack_w(params["wh2_t"]),
    ]).astype(_BF16)                               # [4, L, L]

    gamma, beta = params["gamma"], params["beta"]
    if Dp != D:
        gamma = jnp.pad(gamma, ((0, 0), (0, Dp - D)))
        beta = jnp.pad(beta, ((0, 0), (0, Dp - D)))

    def bn_scale_shift(s_row, q_row, g, b):
        # Combine the G lane groups, then one-pass moments -> scale / shift.
        # (Conv bias preceding training-mode BN cancels, so it never appears.)
        s = s_row.reshape(G, Dp).sum(axis=0)
        q = q_row.reshape(G, Dp).sum(axis=0)
        mean = s / M
        var = jnp.maximum(q / M - mean * mean, 0.0)
        scale = g * jax.lax.rsqrt(var + _EPS)
        shift = b - mean * scale
        return jnp.tile(scale, G), jnp.tile(shift, G)

    def pack_rows(rows):
        arr = jnp.stack(rows, axis=0)
        if arr.shape[0] < 8:
            arr = jnp.pad(arr, ((0, 8 - arr.shape[0]), (0, 0)))
        return arr

    # Specs for the 2-D (core_split, tile) grid of passes 1-3.
    row_spec = pl.BlockSpec((TM, L), lambda c, i: (c * inner + i, 0))
    bn_spec = pl.BlockSpec((8, L), lambda c, i: (0, 0))
    mom_spec = pl.BlockSpec((8, L), lambda c, i: (c, 0))     # grid-resident
    w2_spec = pl.BlockSpec((2, L, L), lambda c, i: (0, 0, 0))
    w3_spec = pl.BlockSpec((3, L, L), lambda c, i: (0, 0, 0))
    w1_spec = pl.BlockSpec((L, L), lambda c, i: (0, 0))
    grid13 = (core_splits, inner)

    # Specs for the 1-D parallel grid of pass 4.
    row_spec4 = pl.BlockSpec((TM, L), lambda i: (i, 0))
    bn_spec4 = pl.BlockSpec((8, L), lambda i: (0, 0))
    w1_spec4 = pl.BlockSpec((L, L), lambda i: (0, 0))

    vmem_limit = 32 * 1024 * 1024                  # safe on v5e / v6e / v7x
    cp13 = pltpu.CompilerParams(dimension_semantics=("parallel", "arbitrary"),
                                vmem_limit_bytes=vmem_limit)
    cp4 = pltpu.CompilerParams(dimension_semantics=("parallel",),
                               vmem_limit_bytes=vmem_limit)

    mom_shape = jax.ShapeDtypeStruct((core_splits * 8, L), jnp.float32)

    # ---- pass 1: BN1 / BN2 moments --------------------------------------
    mom12 = pl.pallas_call(
        _stats12_kernel,
        out_shape=mom_shape,
        grid=grid13,
        in_specs=[row_spec, row_spec, w2_spec],
        out_specs=mom_spec,
        compiler_params=cp13,
    )(hs_p, ht_p, w_all[:2])
    mom12 = mom12.reshape(core_splits, 8, L).sum(axis=0)

    sc1, sh1 = bn_scale_shift(mom12[0], mom12[1], gamma[0], beta[0])
    sc2, sh2 = bn_scale_shift(mom12[2], mom12[3], gamma[1], beta[1])
    bn12 = pack_rows([sc1, sh1, sc2, sh2])

    # ---- pass 2: gate + conv_h1, BN3 moments -----------------------------
    t3_p, mom3 = pl.pallas_call(
        _gate_stats3_kernel,
        out_shape=(jax.ShapeDtypeStruct((Mg_pad, L), _BF16), mom_shape),
        grid=grid13,
        in_specs=[row_spec, row_spec, w3_spec, bn_spec],
        out_specs=(row_spec, mom_spec),
        compiler_params=cp13,
    )(hs_p, ht_p, w_all[:3], bn12)
    mom3 = mom3.reshape(core_splits, 8, L).sum(axis=0)

    sc3, sh3 = bn_scale_shift(mom3[0], mom3[1], gamma[2], beta[2])
    bn3 = pack_rows([sc3, sh3])

    # ---- pass 3: h1 (bf16) + conv_h2, BN4 moments -------------------------
    kern3 = functools.partial(_h1_stats4_kernel, tile_rows=TM,
                              inner_tiles=inner, group=G, dim=Dp,
                              m_real=M, need_mask=need_mask)
    h1_p, mom4 = pl.pallas_call(
        kern3,
        out_shape=(jax.ShapeDtypeStruct((Mg_pad, L), _BF16), mom_shape),
        grid=grid13,
        in_specs=[row_spec, w1_spec, bn_spec],
        out_specs=(row_spec, mom_spec),
        compiler_params=cp13,
    )(t3_p, w_all[3], bn3)
    mom4 = mom4.reshape(core_splits, 8, L).sum(axis=0)

    sc4, sh4 = bn_scale_shift(mom4[0], mom4[1], gamma[3], beta[3])
    bn4 = pack_rows([sc4, sh4])

    # ---- pass 4: conv_h2 + BN4 apply (parallel over M tiles) --------------
    out_p = pl.pallas_call(
        _apply_bn4_kernel,
        out_shape=jax.ShapeDtypeStruct((Mg_pad, L), jnp.float32),
        grid=(n_tiles,),
        in_specs=[row_spec4, w1_spec4, bn_spec4],
        out_specs=row_spec4,
        compiler_params=cp4,
    )(h1_p, w_all[3], bn4)

    out = out_p.reshape(Mg_pad * G, Dp)
    if Mg_pad * G != M:
        out = out[:M]
    if Dp != D:
        out = out[:, :D]
    return out.reshape(B, T, N, D)


# ---------------------------------------------------------------------------
# Parameter init (matches the PyTorch module's init) and references
# ---------------------------------------------------------------------------
def _xavier_uniform(key, d_out, d_in):
    # torch.nn.init.xavier_uniform_ on a [out, in, 1, 1] conv weight
    bound = math.sqrt(6.0 / (d_in + d_out))
    return jax.random.uniform(key, (d_out, d_in), jnp.float32, -bound, bound)


def init_params(key, D):
    k1, k2, k3, k4 = jax.random.split(key, 4)
    w_xs = _xavier_uniform(k1, D, D)   # FC_xs (no bias)
    w_xt = _xavier_uniform(k2, D, D)   # FC_xt
    w_h1 = _xavier_uniform(k3, D, D)   # FC_h layer 1
    w_h2 = _xavier_uniform(k4, D, D)   # FC_h layer 2
    return {
        # pre-transposed so y = x @ w  (PyTorch conv does y = x @ W^T)
        "wxs_t": w_xs.T, "wxt_t": w_xt.T, "wh1_t": w_h1.T, "wh2_t": w_h2.T,
        "bias": jnp.zeros((3, D), jnp.float32),   # b_xt, b_h1, b_h2 (zeros init)
        "gamma": jnp.ones((4, D), jnp.float32),   # BN weights (default init)
        "beta": jnp.zeros((4, D), jnp.float32),   # BN biases (default init)
    }


def gated_fusion_reference(HS, HT, params):
    """Exact f32 forward of the PyTorch module (training-mode BatchNorm)."""
    def mm(x, w):
        return jnp.dot(x, w, preferred_element_type=jnp.float32,
                       precision=jax.lax.Precision.HIGHEST)

    def bn(x, g, b):
        mean = jnp.mean(x, axis=(0, 1, 2), keepdims=True)
        var = jnp.mean((x - mean) ** 2, axis=(0, 1, 2), keepdims=True)
        return (x - mean) * jax.lax.rsqrt(var + _EPS) * g + b

    g, bt, bias = params["gamma"], params["beta"], params["bias"]
    xs = bn(mm(HS, params["wxs_t"]), g[0], bt[0])
    xt = bn(mm(HT, params["wxt_t"]) + bias[0], g[1], bt[1])
    z = jax.nn.sigmoid(xs + xt)
    h = z * HS + (1.0 - z) * HT
    h1 = jnp.maximum(bn(mm(h, params["wh1_t"]) + bias[1], g[2], bt[2]), 0.0)
    return bn(mm(h1, params["wh2_t"]) + bias[2], g[3], bt[3])


def gated_fusion_matched_reference(HS, HT, params):
    """Pure-JAX reference mirroring the kernel's precision choices:
    bf16 stored inputs / t3 / h1, bf16 MXU operands, f32 accumulation & stats."""
    B, T, N, D = HS.shape
    M = B * T * N
    f32 = jnp.float32

    def mm(x_bf, w):
        return jnp.dot(x_bf, w.astype(_BF16), preferred_element_type=f32)

    def stats(t, g, b):
        mean = jnp.mean(t, axis=0)
        var = jnp.maximum(jnp.mean(t * t, axis=0) - mean * mean, 0.0)
        scale = g * jax.lax.rsqrt(var + _EPS)
        shift = b - mean * scale
        return scale, shift

    g, bt = params["gamma"], params["beta"]
    hs = HS.reshape(M, D).astype(_BF16)
    ht = HT.reshape(M, D).astype(_BF16)
    t1 = mm(hs, params["wxs_t"])
    t2 = mm(ht, params["wxt_t"])
    s1, sh1 = stats(t1, g[0], bt[0])
    s2, sh2 = stats(t2, g[1], bt[1])
    xs = t1 * s1 + sh1
    xt = t2 * s2 + sh2
    z = jax.nn.sigmoid(xs + xt)
    h = z * hs.astype(f32) + (1.0 - z) * ht.astype(f32)
    t3 = mm(h.astype(_BF16), params["wh1_t"])
    s3, sh3 = stats(t3, g[2], bt[2])
    t3 = t3.astype(_BF16).astype(f32)            # bf16 intermediate storage
    h1 = jnp.maximum(t3 * s3 + sh3, 0.0).astype(_BF16)
    t4 = mm(h1, params["wh2_t"])
    s4, sh4 = stats(t4, g[3], bt[3])
    out = t4 * s4 + sh4
    return out.reshape(B, T, N, D)


if __name__ == "__main__":
    B, T, N, D = 2, 8, 16, 32     # batch, num_step, num_vertex, D
    key = jax.random.PRNGKey(0)
    k_hs, k_ht, k_p = jax.random.split(key, 3)
    HS = jax.random.normal(k_hs, (B, T, N, D), jnp.float32)
    HT = jax.random.normal(k_ht, (B, T, N, D), jnp.float32)
    params = init_params(k_p, D)

    fused = jax.jit(gated_fusion_pallas)
    out = jax.block_until_ready(fused(HS, HT, params))
    assert out.shape == (B, T, N, D)

    # Matched-precision reference (bf16 storage / MXU operands, like the kernel).
    ref_m = gated_fusion_matched_reference(HS, HT, params)
    err_m = float(jnp.max(jnp.abs(out - ref_m)))
    assert err_m < 1e-2, f"mismatch vs matched reference: {err_m}"

    # Full-f32 reference: bounds the total bf16 storage/matmul error.
    ref_f32 = gated_fusion_reference(HS, HT, params)
    err = float(jnp.max(jnp.abs(out - ref_f32)))
    assert err < 0.2, f"bf16 error unexpectedly large: {err}"

    print("KERNEL_OK")
</pallas_src>

<mosaic_0001>
module attributes {stable_mosaic.version = 11 : i64} {
  func.func @_stats12_kernel(%arg0: i32, %arg1: i32, %arg2: memref<64x128xbf16, #tpu.memory_space<vmem>>, %arg3: memref<64x128xbf16, #tpu.memory_space<vmem>>, %arg4: memref<2x128x128xbf16, #tpu.memory_space<vmem>>, %arg5: memref<8x128xf32, #tpu.memory_space<vmem>>) attributes {dimension_semantics = [#tpu.dimension_semantics<parallel>, #tpu.dimension_semantics<arbitrary>], iteration_bounds = array<i64: 1, 1>, scalar_prefetch = 0 : i64, scratch_operands = 0 : i64, tpu.core_type = #tpu.core_type<tc>, window_params = [{transform_indices = @transform_0, window_bounds = array<i64: 64, 128>}, {transform_indices = @transform_1, window_bounds = array<i64: 64, 128>}, {pipeline_mode = #tpu.pipeline_mode<synchronous>, transform_indices = @transform_2, window_bounds = array<i64: 2, 128, 128>}, {transform_indices = @transform_3, window_bounds = array<i64: 8, 128>}]} {
    %c0_i32 = arith.constant 0 : i32
    %0 = arith.cmpi eq, %arg1, %c0_i32 : i32
    %1 = arith.extui %0 : i1 to i32
    %c0_i32_0 = arith.constant 0 : i32
    %2 = arith.cmpi ne, %1, %c0_i32_0 : i32
    scf.if %2 {
      %cst_28 = arith.constant 0.000000e+00 : f32
      %33 = vector.broadcast %cst_28 : f32 to vector<8x128xf32>
      %c0_29 = arith.constant 0 : index
      %c0_30 = arith.constant 0 : index
      %34 = vector.load %arg5[%c0_29, %c0_30] : memref<8x128xf32, #tpu.memory_space<vmem>>, vector<8x128xf32>
      tpu.vector_store %arg5[%c0_29, %c0_30], %33 {strides = array<i32>} : memref<8x128xf32, #tpu.memory_space<vmem>>, vector<8x128xf32>,
    } else {
    }
    %c0 = arith.constant 0 : index
    %c0_1 = arith.constant 0 : index
    %3 = vector.load %arg2[%c0, %c0_1] : memref<64x128xbf16, #tpu.memory_space<vmem>>, vector<64x128xbf16>
    %c0_2 = arith.constant 0 : index
    %c0_3 = arith.constant 0 : index
    %c0_4 = arith.constant 0 : index
    %4 = vector.load %arg4[%c0_2, %c0_3, %c0_4] : memref<2x128x128xbf16, #tpu.memory_space<vmem>>, vector<1x128x128xbf16>
    %5 = vector.shape_cast %4 : vector<1x128x128xbf16> to vector<128x128xbf16>
    %cst = arith.constant dense<0.000000e+00> : vector<64x128xf32>
    %6 = tpu.matmul %3, %5, %cst {dimension_numbers = #tpu.dot_dimension_numbers<[1], [0], [0], [1], [0, 0, 1, 1], [], []>} : vector<64x128xbf16>, vector<128x128xbf16>, vector<64x128xf32> -> vector<64x128xf32>
    %c0_5 = arith.constant 0 : index
    %c0_6 = arith.constant 0 : index
    %7 = vector.load %arg3[%c0_5, %c0_6] : memref<64x128xbf16, #tpu.memory_space<vmem>>, vector<64x128xbf16>
    %c1 = arith.constant 1 : index
    %c0_7 = arith.constant 0 : index
    %c0_8 = arith.constant 0 : index
    %8 = vector.load %arg4[%c1, %c0_7, %c0_8] : memref<2x128x128xbf16, #tpu.memory_space<vmem>>, vector<1x128x128xbf16>
    %9 = vector.shape_cast %8 : vector<1x128x128xbf16> to vector<128x128xbf16>
    %cst_9 = arith.constant dense<0.000000e+00> : vector<64x128xf32>
    %10 = tpu.matmul %7, %9, %cst_9 {dimension_numbers = #tpu.dot_dimension_numbers<[1], [0], [0], [1], [0, 0, 1, 1], [], []>} : vector<64x128xbf16>, vector<128x128xbf16>, vector<64x128xf32> -> vector<64x128xf32>
    %c0_10 = arith.constant 0 : index
    %c0_11 = arith.constant 0 : index
    %11 = vector.load %arg5[%c0_10, %c0_11] : memref<8x128xf32, #tpu.memory_space<vmem>>, vector<1x128xf32>
    %cst_12 = arith.constant dense<0.000000e+00> : vector<128xf32>
    %12 = vector.multi_reduction <add>, %6, %cst_12 [0] : vector<64x128xf32> to vector<128xf32>
    %13 = vector.shape_cast %12 : vector<128xf32> to vector<1x128xf32>
    %14 = arith.addf %11, %13 : vector<1x128xf32>
    %c0_13 = arith.constant 0 : index
    %c0_14 = arith.constant 0 : index
    %15 = vector.load %arg5[%c0_13, %c0_14] : memref<8x128xf32, #tpu.memory_space<vmem>>, vector<1x128xf32>
    tpu.vector_store %arg5[%c0_13, %c0_14], %14 {strides = array<i32>} : memref<8x128xf32, #tpu.memory_space<vmem>>, vector<1x128xf32>,
    %c1_15 = arith.constant 1 : index
    %c0_16 = arith.constant 0 : index
    %16 = vector.load %arg5[%c1_15, %c0_16] : memref<8x128xf32, #tpu.memory_space<vmem>>, vector<1x128xf32>
    %17 = arith.mulf %6, %6 : vector<64x128xf32>
    %cst_17 = arith.constant dense<0.000000e+00> : vector<128xf32>
    %18 = vector.multi_reduction <add>, %17, %cst_17 [0] : vector<64x128xf32> to vector<128xf32>
    %19 = vector.shape_cast %18 : vector<128xf32> to vector<1x128xf32>
    %20 = arith.addf %16, %19 : vector<1x128xf32>
    %c1_18 = arith.constant 1 : index
    %c0_19 = arith.constant 0 : index
    %21 = vector.load %arg5[%c1_18, %c0_19] : memref<8x128xf32, #tpu.memory_space<vmem>>, vector<1x128xf32>
    tpu.vector_store %arg5[%c1_18, %c0_19], %20 {strides = array<i32>} : memref<8x128xf32, #tpu.memory_space<vmem>>, vector<1x128xf32>,
    %c2 = arith.constant 2 : index
    %c0_20 = arith.constant 0 : index
    %22 = vector.load %arg5[%c2, %c0_20] : memref<8x128xf32, #tpu.memory_space<vmem>>, vector<1x128xf32>
    %cst_21 = arith.constant dense<0.000000e+00> : vector<128xf32>
    %23 = vector.multi_reduction <add>, %10, %cst_21 [0] : vector<64x128xf32> to vector<128xf32>
    %24 = vector.shape_cast %23 : vector<128xf32> to vector<1x128xf32>
    %25 = arith.addf %22, %24 : vector<1x128xf32>
    %c2_22 = arith.constant 2 : index
    %c0_23 = arith.constant 0 : index
    %26 = vector.load %arg5[%c2_22, %c0_23] : memref<8x128xf32, #tpu.memory_space<vmem>>, vector<1x128xf32>
    tpu.vector_store %arg5[%c2_22, %c0_23], %25 {strides = array<i32>} : memref<8x128xf32, #tpu.memory_space<vmem>>, vector<1x128xf32>,
    %c3 = arith.constant 3 : index
    %c0_24 = arith.constant 0 : index
    %27 = vector.load %arg5[%c3, %c0_24] : memref<8x128xf32, #tpu.memory_space<vmem>>, vector<1x128xf32>
    %28 = arith.mulf %10, %10 : vector<64x128xf32>
    %cst_25 = arith.constant dense<0.000000e+00> : vector<128xf32>
    %29 = vector.multi_reduction <add>, %28, %cst_25 [0] : vector<64x128xf32> to vector<128xf32>
    %30 = vector.shape_cast %29 : vector<128xf32> to vector<1x128xf32>
    %31 = arith.addf %27, %30 : vector<1x128xf32>
    %c3_26 = arith.constant 3 : index
    %c0_27 = arith.constant 0 : index
    %32 = vector.load %arg5[%c3_26, %c0_27] : memref<8x128xf32, #tpu.memory_space<vmem>>, vector<1x128xf32>
    tpu.vector_store %arg5[%c3_26, %c0_27], %31 {strides = array<i32>} : memref<8x128xf32, #tpu.memory_space<vmem>>, vector<1x128xf32>,
    return
  }
  func.func @transform_0(%arg0: i32, %arg1: i32) -> (i32, i32) {
    %c1_i32 = arith.constant 1 : i32
    %0 = arith.muli %arg0, %c1_i32 : i32
    %1 = arith.addi %0, %arg1 : i32
    %c0_i32 = arith.constant 0 : i32
    %c0_i32_0 = arith.constant 0 : i32
    return %1, %c0_i32 : i32, i32
  }
  func.func @transform_1(%arg0: i32, %arg1: i32) -> (i32, i32) {
    %c1_i32 = arith.constant 1 : i32
    %0 = arith.muli %arg0, %c1_i32 : i32
    %1 = arith.addi %0, %arg1 : i32
    %c0_i32 = arith.constant 0 : i32
    %c0_i32_0 = arith.constant 0 : i32
    return %1, %c0_i32 : i32, i32
  }
  func.func @transform_2(%arg0: i32, %arg1: i32) -> (i32, i32, i32) {
    %c0_i32 = arith.constant 0 : i32
    %c0_i32_0 = arith.constant 0 : i32
    %c0_i32_1 = arith.constant 0 : i32
    %c0_i32_2 = arith.constant 0 : i32
    return %c0_i32, %c0_i32_0, %c0_i32_1 : i32, i32, i32
  }
  func.func @transform_3(%arg0: i32, %arg1: i32) -> (i32, i32) {
    %c0_i32 = arith.constant 0 : i32
    %c0_i32_0 = arith.constant 0 : i32
    return %arg0, %c0_i32 : i32, i32
  }
}

module attributes {stable_mosaic.version = 11 : i64} {
  func.func @_gate_stats3_kernel(%arg0: i32, %arg1: i32, %arg2: memref<64x128xbf16, #tpu.memory_space<vmem>>, %arg3: memref<64x128xbf16, #tpu.memory_space<vmem>>, %arg4: memref<3x128x128xbf16, #tpu.memory_space<vmem>>, %arg5: memref<8x128xf32, #tpu.memory_space<vmem>>, %arg6: memref<64x128xbf16, #tpu.memory_space<vmem>>, %arg7: memref<8x128xf32, #tpu.memory_space<vmem>>) attributes {dimension_semantics = [#tpu.dimension_semantics<parallel>, #tpu.dimension_semantics<arbitrary>], iteration_bounds = array<i64: 1, 1>, scalar_prefetch = 0 : i64, scratch_operands = 0 : i64, tpu.core_type = #tpu.core_type<tc>, window_params = [{transform_indices = @transform_0, window_bounds = array<i64: 64, 128>}, {transform_indices = @transform_1, window_bounds = array<i64: 64, 128>}, {pipeline_mode = #tpu.pipeline_mode<synchronous>, transform_indices = @transform_2, window_bounds = array<i64: 3, 128, 128>}, {pipeline_mode = #tpu.pipeline_mode<synchronous>, transform_indices = @transform_3, window_bounds = array<i64: 8, 128>}, {transform_indices = @transform_4, window_bounds = array<i64: 64, 128>}, {transform_indices = @transform_5, window_bounds = array<i64: 8, 128>}]} {
    %c0_i32 = arith.constant 0 : i32
    %0 = arith.cmpi eq, %arg1, %c0_i32 : i32
    %1 = arith.extui %0 : i1 to i32
    %c0_i32_0 = arith.constant 0 : i32
    %2 = arith.cmpi ne, %1, %c0_i32_0 : i32
    scf.if %2 {
      %cst_34 = arith.constant 0.000000e+00 : f32
      %53 = vector.broadcast %cst_34 : f32 to vector<8x128xf32>
      %c0_35 = arith.constant 0 : index
      %c0_36 = arith.constant 0 : index
      %54 = vector.load %arg7[%c0_35, %c0_36] : memref<8x128xf32, #tpu.memory_space<vmem>>, vector<8x128xf32>
      tpu.vector_store %arg7[%c0_35, %c0_36], %53 {strides = array<i32>} : memref<8x128xf32, #tpu.memory_space<vmem>>, vector<8x128xf32>,
    } else {
    }
    %c0 = arith.constant 0 : index
    %c0_1 = arith.constant 0 : index
    %3 = vector.load %arg2[%c0, %c0_1] : memref<64x128xbf16, #tpu.memory_space<vmem>>, vector<64x128xbf16>
    %c0_2 = arith.constant 0 : index
    %c0_3 = arith.constant 0 : index
    %4 = vector.load %arg3[%c0_2, %c0_3] : memref<64x128xbf16, #tpu.memory_space<vmem>>, vector<64x128xbf16>
    %c0_4 = arith.constant 0 : index
    %c0_5 = arith.constant 0 : index
    %c0_6 = arith.constant 0 : index
    %5 = vector.load %arg4[%c0_4, %c0_5, %c0_6] : memref<3x128x128xbf16, #tpu.memory_space<vmem>>, vector<1x128x128xbf16>
    %6 = vector.shape_cast %5 : vector<1x128x128xbf16> to vector<128x128xbf16>
    %cst = arith.constant dense<0.000000e+00> : vector<64x128xf32>
    %7 = tpu.matmul %3, %6, %cst {dimension_numbers = #tpu.dot_dimension_numbers<[1], [0], [0], [1], [0, 0, 1, 1], [], []>} : vector<64x128xbf16>, vector<128x128xbf16>, vector<64x128xf32> -> vector<64x128xf32>
    %c1 = arith.constant 1 : index
    %c0_7 = arith.constant 0 : index
    %c0_8 = arith.constant 0 : index
    %8 = vector.load %arg4[%c1, %c0_7, %c0_8] : memref<3x128x128xbf16, #tpu.memory_space<vmem>>, vector<1x128x128xbf16>
    %9 = vector.shape_cast %8 : vector<1x128x128xbf16> to vector<128x128xbf16>
    %cst_9 = arith.constant dense<0.000000e+00> : vector<64x128xf32>
    %10 = tpu.matmul %4, %9, %cst_9 {dimension_numbers = #tpu.dot_dimension_numbers<[1], [0], [0], [1], [0, 0, 1, 1], [], []>} : vector<64x128xbf16>, vector<128x128xbf16>, vector<64x128xf32> -> vector<64x128xf32>
    %c0_10 = arith.constant 0 : index
    %c0_11 = arith.constant 0 : index
    %11 = vector.load %arg5[%c0_10, %c0_11] : memref<8x128xf32, #tpu.memory_space<vmem>>, vector<1x128xf32>
    %12 = vector.broadcast %11 : vector<1x128xf32> to vector<64x128xf32>
    %13 = arith.mulf %7, %12 : vector<64x128xf32>
    %c1_12 = arith.constant 1 : index
    %c0_13 = arith.constant 0 : index
    %14 = vector.load %arg5[%c1_12, %c0_13] : memref<8x128xf32, #tpu.memory_space<vmem>>, vector<1x128xf32>
    %15 = vector.broadcast %14 : vector<1x128xf32> to vector<64x128xf32>
    %16 = arith.addf %13, %15 : vector<64x128xf32>
    %c2 = arith.constant 2 : index
    %c0_14 = arith.constant 0 : index
    %17 = vector.load %arg5[%c2, %c0_14] : memref<8x128xf32, #tpu.memory_space<vmem>>, vector<1x128xf32>
    %18 = vector.broadcast %17 : vector<1x128xf32> to vector<64x128xf32>
    %19 = arith.mulf %10, %18 : vector<64x128xf32>
    %c3 = arith.constant 3 : index
    %c0_15 = arith.constant 0 : index
    %20 = vector.load %arg5[%c3, %c0_15] : memref<8x128xf32, #tpu.memory_space<vmem>>, vector<1x128xf32>
    %21 = vector.broadcast %20 : vector<1x128xf32> to vector<64x128xf32>
    %22 = arith.addf %19, %21 : vector<64x128xf32>
    %23 = arith.addf %16, %22 : vector<64x128xf32>
    %24 = arith.negf %23 : vector<64x128xf32>
    %25 = math.exp %24 : vector<64x128xf32>
    %cst_16 = arith.constant 1.000000e+00 : f32
    %26 = vector.broadcast %cst_16 : f32 to vector<64x128xf32>
    %27 = arith.addf %26, %25 : vector<64x128xf32>
    %28 = arith.divf %26, %27 : vector<64x128xf32>
    %29 = arith.extf %3 : vector<64x128xbf16> to vector<64x128xf32>
    %30 = arith.mulf %28, %29 : vector<64x128xf32>
    %cst_17 = arith.constant 1.000000e+00 : f32
    %31 = vector.broadcast %cst_17 : f32 to vector<64x128xf32>
    %32 = arith.subf %31, %28 : vector<64x128xf32>
    %33 = arith.extf %4 : vector<64x128xbf16> to vector<64x128xf32>
    %34 = arith.mulf %32, %33 : vector<64x128xf32>
    %35 = arith.addf %30, %34 : vector<64x128xf32>
    %36 = arith.truncf %35 : vector<64x128xf32> to vector<64x128xbf16>
    %c2_18 = arith.constant 2 : index
    %c0_19 = arith.constant 0 : index
    %c0_20 = arith.constant 0 : index
    %37 = vector.load %arg4[%c2_18, %c0_19, %c0_20] : memref<3x128x128xbf16, #tpu.memory_space<vmem>>, vector<1x128x128xbf16>
    %38 = vector.shape_cast %37 : vector<1x128x128xbf16> to vector<128x128xbf16>
    %cst_21 = arith.constant dense<0.000000e+00> : vector<64x128xf32>
    %39 = tpu.matmul %36, %38, %cst_21 {dimension_numbers = #tpu.dot_dimension_numbers<[1], [0], [0], [1], [0, 0, 1, 1], [], []>} : vector<64x128xbf16>, vector<128x128xbf16>, vector<64x128xf32> -> vector<64x128xf32>
    %40 = arith.truncf %39 : vector<64x128xf32> to vector<64x128xbf16>
    %c0_22 = arith.constant 0 : index
    %c0_23 = arith.constant 0 : index
    %41 = vector.load %arg6[%c0_22, %c0_23] : memref<64x128xbf16, #tpu.memory_space<vmem>>, vector<64x128xbf16>
    tpu.vector_store %arg6[%c0_22, %c0_23], %40 {strides = array<i32>} : memref<64x128xbf16, #tpu.memory_space<vmem>>, vector<64x128xbf16>,
    %c0_24 = arith.constant 0 : index
    %c0_25 = arith.constant 0 : index
    %42 = vector.load %arg7[%c0_24, %c0_25] : memref<8x128xf32, #tpu.memory_space<vmem>>, vector<1x128xf32>
    %cst_26 = arith.constant dense<0.000000e+00> : vector<128xf32>
    %43 = vector.multi_reduction <add>, %39, %cst_26 [0] : vector<64x128xf32> to vector<128xf32>
    %44 = vector.shape_cast %43 : vector<128xf32> to vector<1x128xf32>
    %45 = arith.addf %42, %44 : vector<1x128xf32>
    %c0_27 = arith.constant 0 : index
    %c0_28 = arith.constant 0 : index
    %46 = vector.load %arg7[%c0_27, %c0_28] : memref<8x128xf32, #tpu.memory_space<vmem>>, vector<1x128xf32>
    tpu.vector_store %arg7[%c0_27, %c0_28], %45 {strides = array<i32>} : memref<8x128xf32, #tpu.memory_space<vmem>>, vector<1x128xf32>,
    %c1_29 = arith.constant 1 : index
    %c0_30 = arith.constant 0 : index
    %47 = vector.load %arg7[%c1_29, %c0_30] : memref<8x128xf32, #tpu.memory_space<vmem>>, vector<1x128xf32>
    %48 = arith.mulf %39, %39 : vector<64x128xf32>
    %cst_31 = arith.constant dense<0.000000e+00> : vector<128xf32>
    %49 = vector.multi_reduction <add>, %48, %cst_31 [0] : vector<64x128xf32> to vector<128xf32>
    %50 = vector.shape_cast %49 : vector<128xf32> to vector<1x128xf32>
    %51 = arith.addf %47, %50 : vector<1x128xf32>
    %c1_32 = arith.constant 1 : index
    %c0_33 = arith.constant 0 : index
    %52 = vector.load %arg7[%c1_32, %c0_33] : memref<8x128xf32, #tpu.memory_space<vmem>>, vector<1x128xf32>
    tpu.vector_store %arg7[%c1_32, %c0_33], %51 {strides = array<i32>} : memref<8x128xf32, #tpu.memory_space<vmem>>, vector<1x128xf32>,
    return
  }
  func.func @transform_0(%arg0: i32, %arg1: i32) -> (i32, i32) {
    %c1_i32 = arith.constant 1 : i32
    %0 = arith.muli %arg0, %c1_i32 : i32
    %1 = arith.addi %0, %arg1 : i32
    %c0_i32 = arith.constant 0 : i32
    %c0_i32_0 = arith.constant 0 : i32
    return %1, %c0_i32 : i32, i32
  }
  func.func @transform_1(%arg0: i32, %arg1: i32) -> (i32, i32) {
    %c1_i32 = arith.constant 1 : i32
    %0 = arith.muli %arg0, %c1_i32 : i32
    %1 = arith.addi %0, %arg1 : i32
    %c0_i32 = arith.constant 0 : i32
    %c0_i32_0 = arith.constant 0 : i32
    return %1, %c0_i32 : i32, i32
  }
  func.func @transform_2(%arg0: i32, %arg1: i32) -> (i32, i32, i32) {
    %c0_i32 = arith.constant 0 : i32
    %c0_i32_0 = arith.constant 0 : i32
    %c0_i32_1 = arith.constant 0 : i32
    %c0_i32_2 = arith.constant 0 : i32
    return %c0_i32, %c0_i32_0, %c0_i32_1 : i32, i32, i32
  }
  func.func @transform_3(%arg0: i32, %arg1: i32) -> (i32, i32) {
    %c0_i32 = arith.constant 0 : i32
    %c0_i32_0 = arith.constant 0 : i32
    %c0_i32_1 = arith.constant 0 : i32
    return %c0_i32, %c0_i32_0 : i32, i32
  }
  func.func @transform_4(%arg0: i32, %arg1: i32) -> (i32, i32) {
    %c1_i32 = arith.constant 1 : i32
    %0 = arith.muli %arg0, %c1_i32 : i32
    %1 = arith.addi %0, %arg1 : i32
    %c0_i32 = arith.constant 0 : i32
    %c0_i32_0 = arith.constant 0 : i32
    return %1, %c0_i32 : i32, i32
  }
  func.func @transform_5(%arg0: i32, %arg1: i32) -> (i32, i32) {
    %c0_i32 = arith.constant 0 : i32
    %c0_i32_0 = arith.constant 0 : i32
    return %arg0, %c0_i32 : i32, i32
  }
}

module attributes {stable_mosaic.version = 11 : i64} {
  func.func @_h1_stats4_kernel(%arg0: i32, %arg1: i32, %arg2: memref<64x128xbf16, #tpu.memory_space<vmem>>, %arg3: memref<128x128xbf16, #tpu.memory_space<vmem>>, %arg4: memref<8x128xf32, #tpu.memory_space<vmem>>, %arg5: memref<64x128xbf16, #tpu.memory_space<vmem>>, %arg6: memref<8x128xf32, #tpu.memory_space<vmem>>) attributes {dimension_semantics = [#tpu.dimension_semantics<parallel>, #tpu.dimension_semantics<arbitrary>], iteration_bounds = array<i64: 1, 1>, scalar_prefetch = 0 : i64, scratch_operands = 0 : i64, tpu.core_type = #tpu.core_type<tc>, window_params = [{transform_indices = @transform_0, window_bounds = array<i64: 64, 128>}, {pipeline_mode = #tpu.pipeline_mode<synchronous>, transform_indices = @transform_1, window_bounds = array<i64: 128, 128>}, {pipeline_mode = #tpu.pipeline_mode<synchronous>, transform_indices = @transform_2, window_bounds = array<i64: 8, 128>}, {transform_indices = @transform_3, window_bounds = array<i64: 64, 128>}, {transform_indices = @transform_4, window_bounds = array<i64: 8, 128>}]} {
    %c0_i32 = arith.constant 0 : i32
    %0 = arith.cmpi eq, %arg1, %c0_i32 : i32
    %1 = arith.extui %0 : i1 to i32
    %c0_i32_0 = arith.constant 0 : i32
    %2 = arith.cmpi ne, %1, %c0_i32_0 : i32
    scf.if %2 {
      %cst_20 = arith.constant 0.000000e+00 : f32
      %28 = vector.broadcast %cst_20 : f32 to vector<8x128xf32>
      %c0_21 = arith.constant 0 : index
      %c0_22 = arith.constant 0 : index
      %29 = vector.load %arg6[%c0_21, %c0_22] : memref<8x128xf32, #tpu.memory_space<vmem>>, vector<8x128xf32>
      tpu.vector_store %arg6[%c0_21, %c0_22], %28 {strides = array<i32>} : memref<8x128xf32, #tpu.memory_space<vmem>>, vector<8x128xf32>,
    } else {
    }
    %c0 = arith.constant 0 : index
    %c0_1 = arith.constant 0 : index
    %3 = vector.load %arg2[%c0, %c0_1] : memref<64x128xbf16, #tpu.memory_space<vmem>>, vector<64x128xbf16>
    %4 = arith.extf %3 : vector<64x128xbf16> to vector<64x128xf32>
    %c0_2 = arith.constant 0 : index
    %c0_3 = arith.constant 0 : index
    %5 = vector.load %arg4[%c0_2, %c0_3] : memref<8x128xf32, #tpu.memory_space<vmem>>, vector<1x128xf32>
    %6 = vector.broadcast %5 : vector<1x128xf32> to vector<64x128xf32>
    %7 = arith.mulf %4, %6 : vector<64x128xf32>
    %c1 = arith.constant 1 : index
    %c0_4 = arith.constant 0 : index
    %8 = vector.load %arg4[%c1, %c0_4] : memref<8x128xf32, #tpu.memory_space<vmem>>, vector<1x128xf32>
    %9 = vector.broadcast %8 : vector<1x128xf32> to vector<64x128xf32>
    %10 = arith.addf %7, %9 : vector<64x128xf32>
    %cst = arith.constant 0.000000e+00 : f32
    %11 = vector.broadcast %cst : f32 to vector<64x128xf32>
    %12 = arith.maximumf %10, %11 : vector<64x128xf32>
    %13 = arith.truncf %12 : vector<64x128xf32> to vector<64x128xbf16>
    %c0_5 = arith.constant 0 : index
    %c0_6 = arith.constant 0 : index
    %14 = vector.load %arg5[%c0_5, %c0_6] : memref<64x128xbf16, #tpu.memory_space<vmem>>, vector<64x128xbf16>
    tpu.vector_store %arg5[%c0_5, %c0_6], %13 {strides = array<i32>} : memref<64x128xbf16, #tpu.memory_space<vmem>>, vector<64x128xbf16>,
    %c0_7 = arith.constant 0 : index
    %c0_8 = arith.constant 0 : index
    %15 = vector.load %arg3[%c0_7, %c0_8] : memref<128x128xbf16, #tpu.memory_space<vmem>>, vector<128x128xbf16>
    %cst_9 = arith.constant dense<0.000000e+00> : vector<64x128xf32>
    %16 = tpu.matmul %13, %15, %cst_9 {dimension_numbers = #tpu.dot_dimension_numbers<[1], [0], [0], [1], [0, 0, 1, 1], [], []>} : vector<64x128xbf16>, vector<128x128xbf16>, vector<64x128xf32> -> vector<64x128xf32>
    %c0_10 = arith.constant 0 : index
    %c0_11 = arith.constant 0 : index
    %17 = vector.load %arg6[%c0_10, %c0_11] : memref<8x128xf32, #tpu.memory_space<vmem>>, vector<1x128xf32>
    %cst_12 = arith.constant dense<0.000000e+00> : vector<128xf32>
    %18 = vector.multi_reduction <add>, %16, %cst_12 [0] : vector<64x128xf32> to vector<128xf32>
    %19 = vector.shape_cast %18 : vector<128xf32> to vector<1x128xf32>
    %20 = arith.addf %17, %19 : vector<1x128xf32>
    %c0_13 = arith.constant 0 : index
    %c0_14 = arith.constant 0 : index
    %21 = vector.load %arg6[%c0_13, %c0_14] : memref<8x128xf32, #tpu.memory_space<vmem>>, vector<1x128xf32>
    tpu.vector_store %arg6[%c0_13, %c0_14], %20 {strides = array<i32>} : memref<8x128xf32, #tpu.memory_space<vmem>>, vector<1x128xf32>,
    %c1_15 = arith.constant 1 : index
    %c0_16 = arith.constant 0 : index
    %22 = vector.load %arg6[%c1_15, %c0_16] : memref<8x128xf32, #tpu.memory_space<vmem>>, vector<1x128xf32>
    %23 = arith.mulf %16, %16 : vector<64x128xf32>
    %cst_17 = arith.constant dense<0.000000e+00> : vector<128xf32>
    %24 = vector.multi_reduction <add>, %23, %cst_17 [0] : vector<64x128xf32> to vector<128xf32>
    %25 = vector.shape_cast %24 : vector<128xf32> to vector<1x128xf32>
    %26 = arith.addf %22, %25 : vector<1x128xf32>
    %c1_18 = arith.constant 1 : index
    %c0_19 = arith.constant 0 : index
    %27 = vector.load %arg6[%c1_18, %c0_19] : memref<8x128xf32, #tpu.memory_space<vmem>>, vector<1x128xf32>
    tpu.vector_store %arg6[%c1_18, %c0_19], %26 {strides = array<i32>} : memref<8x128xf32, #tpu.memory_space<vmem>>, vector<1x128xf32>,
    return
  }
  func.func @transform_0(%arg0: i32, %arg1: i32) -> (i32, i32) {
    %c1_i32 = arith.constant 1 : i32
    %0 = arith.muli %arg0, %c1_i32 : i32
    %1 = arith.addi %0, %arg1 : i32
    %c0_i32 = arith.constant 0 : i32
    %c0_i32_0 = arith.constant 0 : i32
    return %1, %c0_i32 : i32, i32
  }
  func.func @transform_1(%arg0: i32, %arg1: i32) -> (i32, i32) {
    %c0_i32 = arith.constant 0 : i32
    %c0_i32_0 = arith.constant 0 : i32
    %c0_i32_1 = arith.constant 0 : i32
    return %c0_i32, %c0_i32_0 : i32, i32
  }
  func.func @transform_2(%arg0: i32, %arg1: i32) -> (i32, i32) {
    %c0_i32 = arith.constant 0 : i32
    %c0_i32_0 = arith.constant 0 : i32
    %c0_i32_1 = arith.constant 0 : i32
    return %c0_i32, %c0_i32_0 : i32, i32
  }
  func.func @transform_3(%arg0: i32, %arg1: i32) -> (i32, i32) {
    %c1_i32 = arith.constant 1 : i32
    %0 = arith.muli %arg0, %c1_i32 : i32
    %1 = arith.addi %0, %arg1 : i32
    %c0_i32 = arith.constant 0 : i32
    %c0_i32_0 = arith.constant 0 : i32
    return %1, %c0_i32 : i32, i32
  }
  func.func @transform_4(%arg0: i32, %arg1: i32) -> (i32, i32) {
    %c0_i32 = arith.constant 0 : i32
    %c0_i32_0 = arith.constant 0 : i32
    return %arg0, %c0_i32 : i32, i32
  }
}

module attributes {stable_mosaic.version = 11 : i64} {
  func.func @_apply_bn4_kernel(%arg0: i32, %arg1: memref<64x128xbf16, #tpu.memory_space<vmem>>, %arg2: memref<128x128xbf16, #tpu.memory_space<vmem>>, %arg3: memref<8x128xf32, #tpu.memory_space<vmem>>, %arg4: memref<64x128xf32, #tpu.memory_space<vmem>>) attributes {dimension_semantics = [#tpu.dimension_semantics<parallel>], iteration_bounds = array<i64: 1>, scalar_prefetch = 0 : i64, scratch_operands = 0 : i64, tpu.core_type = #tpu.core_type<tc>, window_params = [{transform_indices = @transform_0, window_bounds = array<i64: 64, 128>}, {pipeline_mode = #tpu.pipeline_mode<synchronous>, transform_indices = @transform_1, window_bounds = array<i64: 128, 128>}, {pipeline_mode = #tpu.pipeline_mode<synchronous>, transform_indices = @transform_2, window_bounds = array<i64: 8, 128>}, {transform_indices = @transform_3, window_bounds = array<i64: 64, 128>}]} {
    %c0 = arith.constant 0 : index
    %c0_0 = arith.constant 0 : index
    %0 = vector.load %arg1[%c0, %c0_0] : memref<64x128xbf16, #tpu.memory_space<vmem>>, vector<64x128xbf16>
    %c0_1 = arith.constant 0 : index
    %c0_2 = arith.constant 0 : index
    %1 = vector.load %arg2[%c0_1, %c0_2] : memref<128x128xbf16, #tpu.memory_space<vmem>>, vector<128x128xbf16>
    %cst = arith.constant dense<0.000000e+00> : vector<64x128xf32>
    %2 = tpu.matmul %0, %1, %cst {dimension_numbers = #tpu.dot_dimension_numbers<[1], [0], [0], [1], [0, 0, 1, 1], [], []>} : vector<64x128xbf16>, vector<128x128xbf16>, vector<64x128xf32> -> vector<64x128xf32>
    %c0_3 = arith.constant 0 : index
    %c0_4 = arith.constant 0 : index
    %3 = vector.load %arg3[%c0_3, %c0_4] : memref<8x128xf32, #tpu.memory_space<vmem>>, vector<1x128xf32>
    %4 = vector.broadcast %3 : vector<1x128xf32> to vector<64x128xf32>
    %5 = arith.mulf %2, %4 : vector<64x128xf32>
    %c1 = arith.constant 1 : index
    %c0_5 = arith.constant 0 : index
    %6 = vector.load %arg3[%c1, %c0_5] : memref<8x128xf32, #tpu.memory_space<vmem>>, vector<1x128xf32>
    %7 = vector.broadcast %6 : vector<1x128xf32> to vector<64x128xf32>
    %8 = arith.addf %5, %7 : vector<64x128xf32>
    %c0_6 = arith.constant 0 : index
    %c0_7 = arith.constant 0 : index
    %9 = vector.load %arg4[%c0_6, %c0_7] : memref<64x128xf32, #tpu.memory_space<vmem>>, vector<64x128xf32>
    tpu.vector_store %arg4[%c0_6, %c0_7], %8 {strides = array<i32>} : memref<64x128xf32, #tpu.memory_space<vmem>>, vector<64x128xf32>,
    return
  }
  func.func @transform_0(%arg0: i32) -> (i32, i32) {
    %c0_i32 = arith.constant 0 : i32
    %c0_i32_0 = arith.constant 0 : i32
    return %arg0, %c0_i32 : i32, i32
  }
  func.func @transform_1(%arg0: i32) -> (i32, i32) {
    %c0_i32 = arith.constant 0 : i32
    %c0_i32_0 = arith.constant 0 : i32
    %c0_i32_1 = arith.constant 0 : i32
    return %c0_i32, %c0_i32_0 : i32, i32
  }
  func.func @transform_2(%arg0: i32) -> (i32, i32) {
    %c0_i32 = arith.constant 0 : i32
    %c0_i32_0 = arith.constant 0 : i32
    %c0_i32_1 = arith.constant 0 : i32
    return %c0_i32, %c0_i32_0 : i32, i32
  }
  func.func @transform_3(%arg0: i32) -> (i32, i32) {
    %c0_i32 = arith.constant 0 : i32
    %c0_i32_0 = arith.constant 0 : i32
    return %arg0, %c0_i32 : i32, i32
  }
}

</mosaic_0001>

<bundles_post_ra>
// kernel: squeeze.20
= control target key start
LH: loop header
LB: loop body
LE: loop exit
PB: predicated region body
PF: predicated region fallthrough
CT: control target
= control target key end

     0   :  { %s40_s8 = smov 32   ;;  %vm8_vm0 = vcmask 261120   ;;  %s41_s9 = smov 64   ;;  %s58_s0 = inlined_call_operand.vmem [shape: f32[128], index: 0, kind: input, shape index: {}]   ;;  %s59_s1 = inlined_call_operand.vmem [shape: f32[4,32], index: 1, kind: output, shape index: {}]  }
   0x1   :  { %v5_v0 = vld [vmem:[%s58_s0] sm:$0x1]  ;;  %s39_s0 = smov 96  }
   0x2   :  { %6 = vst [vmem:[#allocation1] sm:$0x1] %v5_v0 }
   0x9   :  { %v10_v1 = vld [vmem:[#allocation1] sm:$0x1]  }
   0xa   :  { %v22_v2 = vld [vmem:[#allocation1] sm:$0x1]   ;;  %11 = vrot.lane.b32.xlu0 %v10_v1, %s39_s0 }
   0xb   :  { %23 = vrot.lane.b32.xlu1 %v22_v2, %s40_s8  ;;  %v7_v3 = vld [vmem:[#allocation1] sm:$0x1]  }
   0xc   :  { %v16_v4 = vld [vmem:[#allocation1] sm:$0x1]   ;;  %9 = vst.msk [vmem:[#allocation0] sm:$0x1] %vm8_vm0, %v7_v3  }
   0xe   :  { %17 = vrot.lane.b32.xlu0 %v16_v4, %s41_s9 }
  0x7c   :  { %v12_v5 = vpop.permute.xlu0 %11  }
  0x7d   :  { %v24_v6 = vpop.permute.xlu1 %23   ;;  %15 = vst.msk [vmem:[#allocation0 + $0x1] sm:$0x1] %vm8_vm0, %v12_v5  }
  0x7e   :  { %27 = vst.msk [vmem:[#allocation0 + $0x3] sm:$0x1] %vm8_vm0, %v24_v6  }
  0x80   :  { %v18_v7 = vpop.permute.xlu0 %17  }
  0x81   :  { %21 = vst.msk [vmem:[#allocation0 + $0x2] sm:$0x1] %vm8_vm0, %v18_v7  }
  0x88   :  { %v32_v8 = vld [vmem:[#allocation0] sm:$0xf] }
  0x89   :  { %35 = vst [vmem:[%s59_s1] sm:$0xf] %v32_v8 }

// kernel: tile.43
= control target key start
LH: loop header
LB: loop body
LE: loop exit
PB: predicated region body
PF: predicated region fallthrough
CT: control target
= control target key end

     0   :  { %s22_s0 = inlined_call_operand.vmem [shape: f32[32], index: 0, kind: input, shape index: {}]   ;;  %s23_s1 = inlined_call_operand.vmem [shape: f32[4,32], index: 1, kind: output, shape index: {}]  }
   0x1   :  { %v4_v0 = vld [vmem:[%s22_s0] ss:$0 sm:$0xff] }
   0x2   :  { %5 = vst [vmem:[%s23_s1] sm:$0xf] %v4_v0 }

// kernel: tile.56
= control target key start
LH: loop header
LB: loop body
LE: loop exit
PB: predicated region body
PF: predicated region fallthrough
CT: control target
= control target key end

     0   :  { %vm8_vm0 = vcmask 261120   ;;  %s40_s8 = smov 32   ;;  %s41_s9 = smov 64   ;;  %vm14_vm1 = vcmask 1048320   ;;  %vm20_vm2 = vcmask 785920   ;;  %vm26_vm3 = vcmask 523520   ;;  %s58_s0 = inlined_call_operand.vmem [shape: f32[4,32], index: 0, kind: input, shape index: {}]   ;;  %s59_s1 = inlined_call_operand.vmem [shape: f32[1,128], index: 1, kind: output, shape index: {}]  }
   0x1   :  { %v5_v0 = vld [vmem:[%s58_s0] sm:$0xf]  ;;  %s39_s0 = smov 96  }
   0x2   :  { %6 = vst [vmem:[#allocation1] sm:$0xf] %v5_v0 }
   0x9   :  { %v11_v1 = vld [vmem:[#allocation1 + $0x3] sm:$0x1]   ;;  %v23_v2 = vld [vmem:[#allocation1 + $0x1] sm:$0x1]   ;;  %v7_v3 = vld [vmem:[#allocation1] sm:$0x1]  }
   0xa   :  { %12 = vrot.lane.b32.xlu0 %v11_v1, %s39_s0  ;;  %24 = vrot.lane.b32.xlu1 %v23_v2, %s40_s8  ;;  %v17_v4 = vld [vmem:[#allocation1 + $0x2] sm:$0x1]   ;;  %9 = vst.msk [vmem:[#allocation0] sm:$0x1] %vm8_vm0, %v7_v3  }
   0xe   :  { %18 = vrot.lane.b32.xlu0 %v17_v4, %s41_s9 }
  0x7c   :  { %v13_v5 = vpop.permute.xlu0 %12   ;;  %v25_v6 = vpop.permute.xlu1 %24  }
  0x7d   :  { %15 = vst.msk [vmem:[#allocation0] sm:$0x1] %vm14_vm1, %v13_v5  }
  0x80   :  { %v19_v7 = vpop.permute.xlu0 %18  }
  0x81   :  { %21 = vst.msk [vmem:[#allocation0] sm:$0x1] %vm20_vm2, %v19_v7  }
  0x82   :  { %27 = vst.msk [vmem:[#allocation0] sm:$0x1] %vm26_vm3, %v25_v6  }
  0x89   :  { %v32_v8 = vld [vmem:[#allocation0] sm:$0x1] }
  0x8a   :  { %35 = vst [vmem:[%s59_s1] sm:$0x1] %v32_v8 }

// kernel: squeeze.30
= control target key start
LH: loop header
LB: loop body
LE: loop exit
PB: predicated region body
PF: predicated region fallthrough
CT: control target
= control target key end

     0   :  { %vm2052_vm0 = vcmask 1047556   ;;  %s3297_s27 = smov 96   ;;  %vm2054_vm1 = vcmask 261120   ;;  %s3299_s23 = smov 32   ;;  %vm2199_vm2 = vcmask 1048320   ;;  %vm2374_vm3 = vcmask 785920   ;;  %s3637_s0 = inlined_call_operand.vmem [shape: bf16[4,32,4,32], index: 0, kind: input, shape index: {}]   ;;  %s3638_s1 = inlined_call_operand.vmem [shape: bf16[128,128], index: 1, kind: output, shape index: {}]  }
   0x1   :  { %v3073_v0 = vld [vmem:[%s3637_s0 + $0x4e] sm:$0xff]   ;;  %v3074_v1 = vld [vmem:[%s3637_s0 + $0x46] sm:$0xff]   ;;  %v3080_v6 = vld [vmem:[%s3637_s0 + $0x40] sm:$0x3]  ;;  %vm2549_vm4 = vcmask 523520  }
   0x2   :  { %v3319_v2 = vld [vmem:[%s3637_s0 + $0x26] ss:$28 sps:$4 sm:$0xff]   ;;  %v1426_v3 = vunpack.c.l.bf16 %v3073_v0  ;;  %v1442_v4 = vunpack.c.h.bf16 %v3074_v1  ;;  %v1474_v5 = vunpack.c.l.bf16 %v3074_v1  ;;  %v3105_v7 = vld [vmem:[%s3637_s0 + $0xe] sm:$0xff]   ;;  %v1538_v10 = vunpack.c.l.bf16 %v3080_v6  ;;  %v2046_v12 = vld [vmem:[%s3637_s0] sm:$0x3] }
   0x3   :  { %v3106_v8 = vld [vmem:[%s3637_s0 + $0x6] sm:$0xff]   ;;  %v1506_v9 = vunpack.c.h.bf16 %v3319_v2  ;;  %v3342_v13 = vld [vmem:[%s3637_s0 + $0x5e] sm:$0xff]   ;;  %v1938_v14 = vunpack.c.l.bf16 %v3105_v7  ;;  %v3066_v17 = vld [vmem:[%s3637_s0 + $0x56] sm:$0xff]   ;;  %v2047_v19 = vunpack.c.l.bf16 %v2046_v12  ;;  %v1378_v25 = vunpack.c.h.bf16 %v3073_v0 }
   0x4   :  { %v3334_v11 = vld [vmem:[%s3637_s0 + $0x2] ss:$228 sps:$4 sm:$0xff]   ;;  %1429 = vst [vmem:[#allocation1 + $0x138] ss:$8 sps:$4 sm:$0xff] %v1426_v3   ;;  %1445 = vst [vmem:[#allocation1 + $0x128] ss:$8 sps:$4 sm:$0xff] %v1442_v4   ;;  %v1954_v15 = vunpack.c.h.bf16 %v3106_v8  ;;  %v1986_v16 = vunpack.c.l.bf16 %v3106_v8  ;;  %v1298_v22 = vunpack.c.l.bf16 %v3342_v13  ;;  %v1314_v23 = vunpack.c.h.bf16 %v3066_v17 }
   0x5   :  { %1477 = vst [vmem:[#allocation1 + $0x118] ss:$8 sps:$4 sm:$0xff] %v1474_v5   ;;  %1509 = vst [vmem:[#allocation1 + $0x108] ss:$8 sps:$4 sm:$0xff] %v1506_v9   ;;  %v2018_v18 = vunpack.c.l.bf16 %v3334_v11  ;;  %v3351_v20 = vld [vmem:[%s3637_s0 + $0x1e] sm:$0xff]   ;;  %v3098_v21 = vld [vmem:[%s3637_s0 + $0x16] sm:$0xff]   ;;  %v1346_v24 = vunpack.c.l.bf16 %v3066_v17  ;;  %v1890_v33 = vunpack.c.h.bf16 %v3105_v7  ;;  %v1250_v13 = vunpack.c.h.bf16 %v3342_v13 }
   0x6   :  { %1541 = vst [vmem:[#allocation1 + $0x100] sm:$0xf] %v1538_v10  ;;  %1941 = vst [vmem:[#allocation1 + $0x38] ss:$8 sps:$4 sm:$0xff] %v1938_v14   ;;  %v3360_v26 = vld [vmem:[%s3637_s0 + $0xce] sm:$0xff]   ;;  %v3010_v27 = vld [vmem:[%s3637_s0 + $0xc6] sm:$0xff]   ;;  %v1810_v28 = vunpack.c.l.bf16 %v3351_v20  ;;  %v1826_v29 = vunpack.c.h.bf16 %v3098_v21  ;;  %v1858_v30 = vunpack.c.l.bf16 %v3098_v21  ;;  %v1730_v2 = vunpack.c.l.bf16 %v3319_v2 }
   0x7   :  { %1957 = vst [vmem:[#allocation1 + $0x28] ss:$8 sps:$4 sm:$0xff] %v1954_v15   ;;  %1989 = vst [vmem:[#allocation1 + $0x18] ss:$8 sps:$4 sm:$0xff] %v1986_v16   ;;  %v3369_v31 = vld [vmem:[%s3637_s0 + $0xa6] ss:$28 sps:$4 sm:$0xff]   ;;  %v402_v36 = vunpack.c.l.bf16 %v3360_v26  ;;  %v418_v37 = vunpack.c.h.bf16 %v3010_v27  ;;  %v450_v38 = vunpack.c.l.bf16 %v3010_v27  ;;  %v354_v61 = vunpack.c.h.bf16 %v3360_v26 }
   0x8   :  { %2021 = vst [vmem:[#allocation1 + $0x8] ss:$8 sps:$4 sm:$0xff] %v2018_v18   ;;  %2049 = vst [vmem:[#allocation1] sm:$0xf] %v2047_v19  ;;  %v3377_v34 = vld [vmem:[%s3637_s0 + $0x8e] sm:$0xff]   ;;  %v3042_v35 = vld [vmem:[%s3637_s0 + $0x86] sm:$0xff]   ;;  %v482_v41 = vunpack.c.h.bf16 %v3369_v31  ;;  %v1762_v20 = vunpack.c.h.bf16 %v3351_v20  ;;  %v194_v11 = vunpack.c.h.bf16 %v3334_v11  ;;  %v706_v31 = vunpack.c.l.bf16 %v3369_v31 }
   0x9   :  { %1301 = vst [vmem:[#allocation1 + $0x178] ss:$8 sps:$4 sm:$0xff] %v1298_v22   ;;  %1317 = vst [vmem:[#allocation1 + $0x168] ss:$8 sps:$4 sm:$0xff] %v1314_v23   ;;  %v3046_v39 = vld [vmem:[%s3637_s0 + $0x7e] sm:$0xff]   ;;  %v3002_v44 = vld [vmem:[%s3637_s0 + $0xd6] sm:$0xff]   ;;  %v914_v46 = vunpack.c.l.bf16 %v3377_v34  ;;  %v930_v47 = vunpack.c.h.bf16 %v3042_v35  ;;  %v962_v48 = vunpack.c.l.bf16 %v3042_v35  ;;  %v866_v9 = vunpack.c.h.bf16 %v3377_v34 }
   0xa   :  { %1349 = vst [vmem:[#allocation1 + $0x158] ss:$8 sps:$4 sm:$0xff] %v1346_v24   ;;  %v3016_v32 = vld [vmem:[%s3637_s0 + $0x32] ss:$142 sps:$2 sm:$0xf]   ;;  %v994_v51 = vunpack.c.h.bf16 %v3046_v39  ;;  %v1026_v54 = vunpack.c.l.bf16 %v3046_v39  ;;  %v290_v56 = vunpack.c.h.bf16 %v3002_v44  ;;  %v3034_v57 = vld [vmem:[%s3637_s0 + $0x96] sm:$0xff]   ;;  %v322_v60 = vunpack.c.l.bf16 %v3002_v44 }
   0xb   :  { %1381 = vst [vmem:[#allocation1 + $0x148] ss:$8 sps:$4 sm:$0xff] %v1378_v25   ;;  %1813 = vst [vmem:[#allocation1 + $0x78] ss:$8 sps:$4 sm:$0xff] %v1810_v28   ;;  %v514_v42 = vunpack.c.l.bf16 %v3016_v32  ;;  %v3390_v43 = vld [vmem:[%s3637_s0 + $0xde] sm:$0xff]   ;;  %v3412_v1 = vld [vmem:[%s3637_s0 + $0x6e] sm:$0xff]   ;;  %v802_v6 = vunpack.c.h.bf16 %v3034_v57  ;;  %v834_v7 = vunpack.c.l.bf16 %v3034_v57 }
   0xc   :  { %1829 = vst [vmem:[#allocation1 + $0x68] ss:$8 sps:$4 sm:$0xff] %v1826_v29   ;;  %1861 = vst [vmem:[#allocation1 + $0x58] ss:$8 sps:$4 sm:$0xff] %v1858_v30   ;;  %v3400_v52 = vld [vmem:[%s3637_s0 + $0x9e] sm:$0xff]   ;;  %v274_v55 = vunpack.c.l.bf16 %v3390_v43  ;;  %v3058_v3 = vld [vmem:[%s3637_s0 + $0x66] sm:$0xff]   ;;  %v1170_v15 = vunpack.c.l.bf16 %v3412_v1 }
   0xd   :  { %v2204_v40 = vld [vmem:[#allocation1 + $0x103] ss:$8 sm:$0xf0]   ;;  %1893 = vst [vmem:[#allocation1 + $0x48] ss:$8 sps:$4 sm:$0xff] %v1890_v33   ;;  %v786_v0 = vunpack.c.l.bf16 %v3400_v52  ;;  %v1186_v16 = vunpack.c.h.bf16 %v3058_v3  ;;  %v1218_v19 = vunpack.c.l.bf16 %v3058_v3 }
   0xe   :  { %v2202_v45 = vld [vmem:[#allocation1 + $0x103] ss:$8 sm:$0xf]   ;;  %405 = vst [vmem:[#allocation1 + $0x338] ss:$8 sps:$4 sm:$0xff] %v402_v36   ;;  %v226_v36 = vunpack.c.h.bf16 %v3390_v43 }
   0xf   :  { %421 = vst [vmem:[#allocation1 + $0x328] ss:$8 sps:$4 sm:$0xff] %v418_v37   ;;  %453 = vst [vmem:[#allocation1 + $0x318] ss:$8 sps:$4 sm:$0xff] %v450_v38   ;;  %v2206_v50 = vsel %vm2052_vm0, %v2204_v40, %v2202_v45  ;;  %v3089_v10 = vld [vmem:[%s3637_s0 + $0x2a] sm:$0xff]   ;;  %v3050_v40 = vld [vmem:[%s3637_s0 + $0x76] sm:$0xff]  }
  0x10   :  { %v2194_v49 = vld [vmem:[#allocation1 + $0x3] ss:$8 sm:$0xf0]   ;;  %485 = vst [vmem:[#allocation1 + $0x308] ss:$8 sps:$4 sm:$0xff] %v482_v41   ;;  %v1682_v24 = vunpack.c.h.bf16 %v3089_v10  ;;  %v1698_v25 = vunpack.c.l.bf16 %v3089_v10 }
  0x11   :  { %517 = vst [vmem:[#allocation1 + $0xc8] ss:$568 sps:$4 sm:$0xff] %v514_v42   ;;  %v2192_v53 = vld [vmem:[#allocation1 + $0x3] ss:$8 sm:$0xf]   ;;  %v738_v42 = vunpack.c.h.bf16 %v3400_v52  ;;  %v1122_v52 = vunpack.c.h.bf16 %v3412_v1 }
  0x12   :  { %917 = vst [vmem:[#allocation1 + $0x238] ss:$8 sps:$4 sm:$0xff] %v914_v46   ;;  %933 = vst [vmem:[#allocation1 + $0x228] ss:$8 sps:$4 sm:$0xff] %v930_v47   ;;  %v2196_v58 = vsel %vm2052_vm0, %v2194_v49, %v2192_v53  ;;  %v2993_v21 = vld [vmem:[%s3637_s0 + $0xea] sm:$0xff]   ;;  %v3081_v44 = vld [vmem:[%s3637_s0 + $0x38] sm:$0xff]   ;;  %v1058_v49 = vunpack.c.h.bf16 %v3050_v40 }
  0x13   :  { %965 = vst [vmem:[#allocation1 + $0x218] ss:$8 sps:$4 sm:$0xff] %v962_v48   ;;  %v2248_v59 = vld [vmem:[#allocation1 + $0x143] ss:$8 sm:$0xf0]   ;;  %v3177_v62 = vpack.i.bf16 %v2206_v50, %v2196_v58  ;;  %v146_v27 = vunpack.c.h.bf16 %v2993_v21  ;;  %v162_v33 = vunpack.c.l.bf16 %v2993_v21  ;;  %v1090_v50 = vunpack.c.l.bf16 %v3050_v40 }
  0x14   :  { %997 = vst [vmem:[#allocation1 + $0x208] ss:$8 sps:$4 sm:$0xff] %v994_v51   ;;  %v2246_v63 = vld [vmem:[#allocation1 + $0x143] ss:$8 sm:$0xf]  }
  0x15   :  { %1029 = vst [vmem:[#allocation1 + $0x1f8] ss:$8 sps:$4 sm:$0xff] %v1026_v54   ;;  %277 = vst [vmem:[#allocation1 + $0x378] ss:$8 sps:$4 sm:$0xff] %v274_v55   ;;  %v2250_v5 = vsel %vm2052_vm0, %v2248_v59, %v2246_v63  ;;  %3178 = vrot.lane.b32.xlu0 %v3177_v62, %s3297_s27  ;;  %v3025_v28 = vld [vmem:[%s3637_s0 + $0xaa] sm:$0xff]   ;;  %v2985_v53 = vld [vmem:[%s3637_s0 + $0xf8] sm:$0xff]   ;;  %v1554_v55 = vunpack.c.h.bf16 %v3081_v44 }
  0x16   :  { %293 = vst [vmem:[#allocation1 + $0x368] ss:$8 sps:$4 sm:$0xff] %v290_v56   ;;  %v2237_v4 = vld [vmem:[#allocation1 + $0x43] ss:$8 sm:$0xf0]   ;;  %v658_v38 = vunpack.c.h.bf16 %v3025_v28  ;;  %v674_v39 = vunpack.c.l.bf16 %v3025_v28  ;;  %v1586_v56 = vunpack.c.l.bf16 %v3081_v44  ;;  %v18_v63 = vunpack.c.h.bf16 %v2985_v53 }
  0x17   :  { %325 = vst [vmem:[#allocation1 + $0x358] ss:$8 sps:$4 sm:$0xff] %v322_v60   ;;  %357 = vst [vmem:[#allocation1 + $0x348] ss:$8 sps:$4 sm:$0xff] %v354_v61   ;;  %v3085_v45 = vld [vmem:[%s3637_s0 + $0x34] sm:$0xf]  }
  0x18   :  { %v2235_v8 = vld [vmem:[#allocation1 + $0x43] ss:$8 sm:$0xf]   ;;  %789 = vst [vmem:[#allocation1 + $0x278] ss:$8 sps:$4 sm:$0xff] %v786_v0   ;;  %v1618_v59 = vunpack.c.l.bf16 %v3085_v45 }
  0x19   :  { %v2239_v12 = vsel %vm2052_vm0, %v2237_v4, %v2235_v8  ;;  %v2226_v14 = vld [vmem:[#allocation1 + $0x303] ss:$8 sm:$0xf0]   ;;  %805 = vst [vmem:[#allocation1 + $0x268] ss:$8 sps:$4 sm:$0xff] %v802_v6  }
  0x1a   :  { %837 = vst [vmem:[#allocation1 + $0x258] ss:$8 sps:$4 sm:$0xff] %v834_v7   ;;  %v3187_v17 = vpack.i.bf16 %v2250_v5, %v2239_v12  ;;  %v2224_v18 = vld [vmem:[#allocation1 + $0x303] ss:$8 sm:$0xf]   ;;  %v50_v5 = vunpack.c.l.bf16 %v2985_v53 }
  0x1b   :  { %869 = vst [vmem:[#allocation1 + $0x248] ss:$8 sps:$4 sm:$0xff] %v866_v9   ;;  %v2215_v22 = vld [vmem:[#allocation1 + $0x203] ss:$8 sm:$0xf0]   ;;  %v2228_v23 = vsel %vm2052_vm0, %v2226_v14, %v2224_v18 }
  0x1c   :  { %1173 = vst [vmem:[#allocation1 + $0x1b8] ss:$8 sps:$4 sm:$0xff] %v1170_v15   ;;  %1189 = vst [vmem:[#allocation1 + $0x1a8] ss:$8 sps:$4 sm:$0xff] %v1186_v16   ;;  %3188 = vrot.lane.b32.xlu1 %v3187_v17, %s3297_s27  ;;  %v2989_v57 = vld [vmem:[%s3637_s0 + $0xf4] sm:$0xf]  }
  0x1d   :  { %1221 = vst [vmem:[#allocation1 + $0x198] ss:$8 sps:$4 sm:$0xff] %v1218_v19   ;;  %1253 = vst [vmem:[#allocation1 + $0x188] ss:$8 sps:$4 sm:$0xff] %v1250_v13   ;;  %v2991_v60 = vld [vmem:[%s3637_s0 + $0xf2] sm:$0x3]  ;;  %v82_v6 = vunpack.c.l.bf16 %v2989_v57 }
  0x1e   :  { %v2213_v26 = vld [vmem:[#allocation1 + $0x203] ss:$8 sm:$0xf]   ;;  %1685 = vst [vmem:[#allocation1 + $0xb8] ss:$8 sps:$4 sm:$0xff] %v1682_v24   ;;  %v114_v9 = vunpack.c.l.bf16 %v2991_v60 }
  0x1f   :  { %v2217_v29 = vsel %vm2052_vm0, %v2215_v22, %v2213_v26  ;;  %v2268_v30 = vld [vmem:[#allocation1 + $0x343] ss:$8 sm:$0xf]   ;;  %1701 = vst [vmem:[#allocation1 + $0xa8] ss:$8 sps:$4 sm:$0xff] %v1698_v25  }
  0x20   :  { %v2270_v32 = vld [vmem:[#allocation1 + $0x343] ss:$8 sm:$0xf0]   ;;  %1733 = vst [vmem:[#allocation1 + $0x98] ss:$8 sps:$4 sm:$0xff] %v1730_v2   ;;  %v3182_v34 = vpack.i.bf16 %v2228_v23, %v2217_v29 }
  0x21   :  { %v2272_v35 = vsel %vm2052_vm0, %v2270_v32, %v2268_v30  ;;  %1765 = vst [vmem:[#allocation1 + $0x88] ss:$8 sps:$4 sm:$0xff] %v1762_v20   ;;  %149 = vst [vmem:[#allocation1 + $0x3b8] ss:$8 sps:$4 sm:$0xff] %v146_v27   ;;  %v3017_v0 = vld [vmem:[%s3637_s0 + $0xb8] sm:$0xff]  }
  0x22   :  { %v2259_v37 = vld [vmem:[#allocation1 + $0x243] ss:$8 sm:$0xf0]   ;;  %165 = vst [vmem:[#allocation1 + $0x3a8] ss:$8 sps:$4 sm:$0xff] %v162_v33   ;;  %3183 = vrot.lane.b32.xlu0 %v3182_v34, %s3297_s27  ;;  %v530_v14 = vunpack.c.h.bf16 %v3017_v0  ;;  %v562_v15 = vunpack.c.l.bf16 %v3017_v0 }
  0x23   :  { %197 = vst [vmem:[#allocation1 + $0x398] ss:$8 sps:$4 sm:$0xff] %v194_v11   ;;  %v2257_v41 = vld [vmem:[#allocation1 + $0x243] ss:$8 sm:$0xf]  }
  0x24   :  { %229 = vst [vmem:[#allocation1 + $0x388] ss:$8 sps:$4 sm:$0xff] %v226_v36   ;;  %v2261_v43 = vsel %vm2052_vm0, %v2259_v37, %v2257_v41  ;;  %661 = vst [vmem:[#allocation1 + $0x2b8] ss:$8 sps:$4 sm:$0xff] %v658_v38   ;;  %v3021_v1 = vld [vmem:[%s3637_s0 + $0xb4] sm:$0xf]  }
  0x25   :  { %677 = vst [vmem:[#allocation1 + $0x2a8] ss:$8 sps:$4 sm:$0xff] %v674_v39   ;;  %v3192_v46 = vpack.i.bf16 %v2272_v35, %v2261_v43  ;;  %v2290_v47 = vld [vmem:[#allocation1 + $0x183] ss:$8 sm:$0xf]   ;;  %v594_v17 = vunpack.c.l.bf16 %v3021_v1 }
  0x26   :  { %v2292_v48 = vld [vmem:[#allocation1 + $0x183] ss:$8 sm:$0xf0]   ;;  %709 = vst [vmem:[#allocation1 + $0x298] ss:$8 sps:$4 sm:$0xff] %v706_v31  }
  0x27   :  { %741 = vst [vmem:[#allocation1 + $0x288] ss:$8 sps:$4 sm:$0xff] %v738_v42   ;;  %v2294_v51 = vsel %vm2052_vm0, %v2292_v48, %v2290_v47  ;;  %3193 = vrot.lane.b32.xlu1 %v3192_v46, %s3297_s27  ;;  %v2281_v54 = vld [vmem:[#allocation1 + $0x83] ss:$8 sm:$0xf0]  }
  0x28   :  { %1061 = vst [vmem:[#allocation1 + $0x1e8] ss:$8 sps:$4 sm:$0xff] %v1058_v49   ;;  %1093 = vst [vmem:[#allocation1 + $0x1d8] ss:$8 sps:$4 sm:$0xff] %v1090_v50   ;;  %v3023_v7 = vld [vmem:[%s3637_s0 + $0xb2] sm:$0x3] }
  0x29   :  { %v2279_v58 = vld [vmem:[#allocation1 + $0x83] ss:$8 sm:$0xf]   ;;  %1125 = vst [vmem:[#allocation1 + $0x1c8] ss:$8 sps:$4 sm:$0xff] %v1122_v52   ;;  %v626_v18 = vunpack.c.l.bf16 %v3023_v7  ;;  %s3298_s0 = smov 64  }
  0x2a   :  { %v2283_v61 = vsel %vm2052_vm0, %v2281_v54, %v2279_v58  ;;  %v2314_v62 = vld [vmem:[#allocation1 + $0x383] ss:$8 sm:$0xf0]   ;;  %1557 = vst [vmem:[#allocation1 + $0xf0] ss:$8 sps:$4 sm:$0xff] %v1554_v55  }
  0x2b   :  { %1589 = vst [vmem:[#allocation1 + $0xe0] ss:$8 sps:$4 sm:$0xff] %v1586_v56   ;;  %v3197_v3 = vpack.i.bf16 %v2294_v51, %v2283_v61  ;;  %v2312_v4 = vld [vmem:[#allocation1 + $0x383] ss:$8 sm:$0xf]  }
  0x2c   :  { %1621 = vst [vmem:[#allocation1 + $0xd0] ss:$8 sps:$4 sm:$0xff] %v1618_v59   ;;  %v2316_v8 = vsel %vm2052_vm0, %v2314_v62, %v2312_v4  ;;  %21 = vst [vmem:[#allocation1 + $0x3f0] ss:$8 sps:$4 sm:$0xff] %v18_v63  }
  0x2d   :  { %3198 = vrot.lane.b32.xlu0 %v3197_v3, %s3297_s27  ;;  %v2303_v12 = vld [vmem:[#allocation1 + $0x283] ss:$8 sm:$0xf0]   ;;  %53 = vst [vmem:[#allocation1 + $0x3e0] ss:$8 sps:$4 sm:$0xff] %v50_v5  }
  0x2e   :  { %v2301_v10 = vld [vmem:[#allocation1 + $0x283] ss:$8 sm:$0xf]   ;;  %85 = vst [vmem:[#allocation1 + $0x3d0] ss:$8 sps:$4 sm:$0xff] %v82_v6  }
  0x2f   :  { %v2305_v16 = vsel %vm2052_vm0, %v2303_v12, %v2301_v10  ;;  %117 = vst [vmem:[#allocation1 + $0x3c8] sm:$0xf] %v114_v9  ;;  %v2367_v19 = vld [vmem:[#allocation1 + $0x2] ss:$8 sm:$0xf]  }
  0x30   :  { %v2369_v13 = vld [vmem:[#allocation1 + $0x2] ss:$8 sm:$0xf0]   ;;  %v3202_v21 = vpack.i.bf16 %v2316_v8, %v2305_v16  ;;  %v2336_v22 = vld [vmem:[#allocation1 + $0x1c3] ss:$8 sm:$0xf0]  }
  0x31   :  { %533 = vst [vmem:[#allocation1 + $0x2f0] ss:$8 sps:$4 sm:$0xff] %v530_v14   ;;  %565 = vst [vmem:[#allocation1 + $0x2e0] ss:$8 sps:$4 sm:$0xff] %v562_v15   ;;  %v2371_v29 = vsel %vm2052_vm0, %v2369_v13, %v2367_v19 }
  0x32   :  { %v2377_v23 = vld [vmem:[#allocation1 + $0x102] ss:$8 sm:$0xf]   ;;  %v2334_v24 = vld [vmem:[#allocation1 + $0x1c3] ss:$8 sm:$0xf]   ;;  %3203 = vrot.lane.b32.xlu1 %v3202_v21, %s3297_s27 }
  0x33   :  { %597 = vst [vmem:[#allocation1 + $0x2d0] ss:$8 sps:$4 sm:$0xff] %v594_v17   ;;  %629 = vst [vmem:[#allocation1 + $0x2c8] sm:$0xf] %v626_v18  ;;  %v2338_v26 = vsel %vm2052_vm0, %v2336_v22, %v2334_v24 }
  0x34   :  { %v2379_v25 = vld [vmem:[#allocation1 + $0x102] ss:$8 sm:$0xf0]   ;;  %v2325_v2 = vld [vmem:[#allocation1 + $0xc3] ss:$8 sm:$0xf0]  }
  0x35   :  { %v2323_v20 = vld [vmem:[#allocation1 + $0xc3] ss:$8 sm:$0xf]   ;;  %v2410_v27 = vld [vmem:[#allocation1 + $0x42] ss:$8 sm:$0xf]   ;;  %v2381_v30 = vsel %vm2052_vm0, %v2379_v25, %v2377_v23 }
  0x36   :  { %v2327_v28 = vsel %vm2052_vm0, %v2325_v2, %v2323_v20  ;;  %v2390_v32 = vld [vmem:[#allocation1 + $0x202] ss:$8 sm:$0xf0]   ;;  %v2358_v37 = vld [vmem:[#allocation1 + $0x3c3] ss:$8 sm:$0xf0]   ;;  %v3217_v42 = vpack.i.bf16 %v2381_v30, %v2371_v29 }
  0x37   :  { %v2399_v33 = vld [vmem:[#allocation1 + $0x302] ss:$8 sm:$0xf]   ;;  %v3207_v36 = vpack.i.bf16 %v2338_v26, %v2327_v28  ;;  %v2356_v39 = vld [vmem:[#allocation1 + $0x3c3] ss:$8 sm:$0xf]  }
  0x38   :  { %v2401_v11 = vld [vmem:[#allocation1 + $0x302] ss:$8 sm:$0xf0]   ;;  %v2347_v41 = vld [vmem:[#allocation1 + $0x2c3] ss:$8 sm:$0xf0]   ;;  %v2360_v31 = vsel %vm2052_vm0, %v2358_v37, %v2356_v39 }
  0x39   :  { %v2412_v34 = vld [vmem:[#allocation1 + $0x42] ss:$8 sm:$0xf0]   ;;  %3208 = vrot.lane.b32.xlu0 %v3207_v36, %s3297_s27  ;;  %v2403_v52 = vsel %vm2052_vm0, %v2401_v11, %v2399_v33  ;;  %v2542_v10 = vld [vmem:[#allocation1 + $0x1] ss:$8 sm:$0xf]  }
  0x3a   :  { %v2421_v35 = vld [vmem:[#allocation1 + $0x142] ss:$8 sm:$0xf]   ;;  %v2345_v44 = vld [vmem:[#allocation1 + $0x2c3] ss:$8 sm:$0xf]   ;;  %v2414_v45 = vsel %vm2052_vm0, %v2412_v34, %v2410_v27 }
  0x3b   :  { %v2423_v38 = vld [vmem:[#allocation1 + $0x142] ss:$8 sm:$0xf0]   ;;  %v2349_v50 = vsel %vm2052_vm0, %v2347_v41, %v2345_v44  ;;  %v2544_v12 = vld [vmem:[#allocation1 + $0x1] ss:$8 sm:$0xf0]  }
  0x3c   :  { %v2388_v40 = vld [vmem:[#allocation1 + $0x202] ss:$8 sm:$0xf]   ;;  %v2425_v46 = vsel %vm2052_vm0, %v2423_v38, %v2421_v35  ;;  %v3212_v55 = vpack.i.bf16 %v2360_v31, %v2349_v50  ;;  %v2552_v18 = vld [vmem:[#allocation1 + $0x101] ss:$8 sm:$0xf]   ;;  %v2546_v26 = vsel %vm2052_vm0, %v2544_v12, %v2542_v10 }
  0x3d   :  { %v2465_v43 = vld [vmem:[#allocation1 + $0x182] ss:$8 sm:$0xf]   ;;  %v2392_v51 = vsel %vm2052_vm0, %v2390_v32, %v2388_v40  ;;  %3218 = vrot.lane.b32.xlu0 %v3217_v42, %s3298_s0  ;;  %v3227_v58 = vpack.i.bf16 %v2425_v46, %v2414_v45  ;;  %v2554_v22 = vld [vmem:[#allocation1 + $0x101] ss:$8 sm:$0xf0]  }
  0x3e   :  { %v2432_v47 = vld [vmem:[#allocation1 + $0x242] ss:$8 sm:$0xf]   ;;  %3213 = vrot.lane.b32.xlu1 %v3212_v55, %s3297_s27  ;;  %v3222_v59 = vpack.i.bf16 %v2403_v52, %v2392_v51  ;;  %v2556_v20 = vsel %vm2052_vm0, %v2554_v22, %v2552_v18  ;;  %v2563_v27 = vld [vmem:[#allocation1 + $0x201] ss:$8 sm:$0xf]  }
  0x3f   :  { %v2434_v48 = vld [vmem:[#allocation1 + $0x242] ss:$8 sm:$0xf0]   ;;  %v2565_v28 = vld [vmem:[#allocation1 + $0x201] ss:$8 sm:$0xf0]   ;;  %v3257_v37 = vpack.i.bf16 %v2556_v20, %v2546_v26 }
  0x40   :  { %v2456_v49 = vld [vmem:[#allocation1 + $0x82] ss:$8 sm:$0xf0]   ;;  %v2436_v3 = vsel %vm2052_vm0, %v2434_v48, %v2432_v47  ;;  %v2585_v29 = vld [vmem:[#allocation1 + $0x41] ss:$8 sm:$0xf]   ;;  %v2567_v50 = vsel %vm2052_vm0, %v2565_v28, %v2563_v27 }
  0x41   :  { %v2454_v53 = vld [vmem:[#allocation1 + $0x82] ss:$8 sm:$0xf]   ;;  %3228 = vrot.lane.b32.xlu0 %v3227_v58, %s3298_s0  ;;  %v2587_v30 = vld [vmem:[#allocation1 + $0x41] ss:$8 sm:$0xf0]  }
  0x42   :  { %v2467_v54 = vld [vmem:[#allocation1 + $0x182] ss:$8 sm:$0xf0]   ;;  %v2458_v60 = vsel %vm2052_vm0, %v2456_v49, %v2454_v53  ;;  %3223 = vrot.lane.b32.xlu1 %v3222_v59, %s3298_s0  ;;  %v2596_v11 = vld [vmem:[#allocation1 + $0x141] ss:$8 sm:$0xf]  }
  0x43   :  { %v2443_v56 = vld [vmem:[#allocation1 + $0x342] ss:$8 sm:$0xf]   ;;  %v2469_v61 = vsel %vm2052_vm0, %v2467_v54, %v2465_v43  ;;  %v2598_v34 = vld [vmem:[#allocation1 + $0x141] ss:$8 sm:$0xf0]   ;;  %v2589_v43 = vsel %vm2052_vm0, %v2587_v30, %v2585_v29 }
  0x44   :  { %v2445_v57 = vld [vmem:[#allocation1 + $0x342] ss:$8 sm:$0xf0]   ;;  %v3237_v9 = vpack.i.bf16 %v2469_v61, %v2458_v60  ;;  %v2574_v35 = vld [vmem:[#allocation1 + $0x301] ss:$8 sm:$0xf]   ;;  %v2600_v44 = vsel %vm2052_vm0, %v2598_v34, %v2596_v11 }
  0x45   :  { %v2487_v62 = vld [vmem:[#allocation1 + $0x382] ss:$8 sm:$0xf]   ;;  %v2447_v4 = vsel %vm2052_vm0, %v2445_v57, %v2443_v56  ;;  %v2576_v36 = vld [vmem:[#allocation1 + $0x301] ss:$8 sm:$0xf0]   ;;  %v3267_v58 = vpack.i.bf16 %v2600_v44, %v2589_v43 }
  0x46   :  { %v2489_v63 = vld [vmem:[#allocation1 + $0x382] ss:$8 sm:$0xf0]   ;;  %v3232_v14 = vpack.i.bf16 %v2447_v4, %v2436_v3  ;;  %3238 = vrot.lane.b32.xlu0 %v3237_v9, %s3298_s0  ;;  %v2629_v38 = vld [vmem:[#allocation1 + $0x81] ss:$8 sm:$0xf]   ;;  %v2578_v51 = vsel %vm2052_vm0, %v2576_v36, %v2574_v35 }
  0x47   :  { %v2509_v0 = vld [vmem:[#allocation1 + $0x1c2] ss:$8 sm:$0xf]   ;;  %v2491_v13 = vsel %vm2052_vm0, %v2489_v63, %v2487_v62  ;;  %v2631_v39 = vld [vmem:[#allocation1 + $0x81] ss:$8 sm:$0xf0]   ;;  %v3262_v3 = vpack.i.bf16 %v2578_v51, %v2567_v50 }
  0x48   :  { %v2511_v1 = vld [vmem:[#allocation1 + $0x1c2] ss:$8 sm:$0xf0]   ;;  %3233 = vrot.lane.b32.xlu1 %v3232_v14, %s3298_s0  ;;  %v2640_v40 = vld [vmem:[#allocation1 + $0x181] ss:$8 sm:$0xf]   ;;  %v2633_v4 = vsel %vm2052_vm0, %v2631_v39, %v2629_v38 }
  0x49   :  { %v2498_v5 = vld [vmem:[#allocation1 + $0xc2] ss:$8 sm:$0xf]   ;;  %v2513_v16 = vsel %vm2052_vm0, %v2511_v1, %v2509_v0  ;;  %v2642_v41 = vld [vmem:[#allocation1 + $0x181] ss:$8 sm:$0xf0]  }
  0x4a   :  { %v2500_v6 = vld [vmem:[#allocation1 + $0xc2] ss:$8 sm:$0xf0]   ;;  %v2050_v31 = vld [vmem:[#allocation1] ss:$8 sm:$0xf]  }
  0x4b   :  { %v2476_v7 = vld [vmem:[#allocation1 + $0x282] ss:$8 sm:$0xf]   ;;  %v2502_v15 = vsel %vm2052_vm0, %v2500_v6, %v2498_v5  ;;  %v2607_v45 = vld [vmem:[#allocation1 + $0x241] ss:$8 sm:$0xf]   ;;  %v2644_v5 = vsel %vm2052_vm0, %v2642_v41, %v2640_v40 }
  0x4c   :  { %v2478_v8 = vld [vmem:[#allocation1 + $0x282] ss:$8 sm:$0xf0]   ;;  %v3247_v25 = vpack.i.bf16 %v2513_v16, %v2502_v15  ;;  %v2609_v46 = vld [vmem:[#allocation1 + $0x241] ss:$8 sm:$0xf0]  }
  0x4d   :  { %v2533_v17 = vld [vmem:[#allocation1 + $0x3c2] ss:$8 sm:$0xf0]   ;;  %v2480_v19 = vsel %vm2052_vm0, %v2478_v8, %v2476_v7  ;;  %v2618_v47 = vld [vmem:[#allocation1 + $0x341] ss:$8 sm:$0xf]   ;;  %v2611_v15 = vsel %vm2052_vm0, %v2609_v46, %v2607_v45 }
  0x4e   :  { %v2531_v21 = vld [vmem:[#allocation1 + $0x3c2] ss:$8 sm:$0xf]   ;;  %v3242_v2 = vpack.i.bf16 %v2491_v13, %v2480_v19  ;;  %3248 = vrot.lane.b32.xlu0 %v3247_v25, %s3298_s0  ;;  %v2620_v48 = vld [vmem:[#allocation1 + $0x341] ss:$8 sm:$0xf0]  }
  0x4f   :  { %v2520_v23 = vld [vmem:[#allocation1 + $0x2c2] ss:$8 sm:$0xf]   ;;  %v2535_v33 = vsel %vm2052_vm0, %v2533_v17, %v2531_v21  ;;  %v2051_v49 = vld [vmem:[#allocation1] ss:$8 sm:$0xf0]   ;;  %v2622_v16 = vsel %vm2052_vm0, %v2620_v48, %v2618_v47 }
  0x50   :  { %v2522_v24 = vld [vmem:[#allocation1 + $0x2c2] ss:$8 sm:$0xf0]   ;;  %3243 = vrot.lane.b32.xlu1 %v3242_v2, %s3298_s0  ;;  %v2053_v52 = vsel %vm2052_vm0, %v2051_v49, %v2050_v31  ;;  %v2084_v53 = vld [vmem:[#allocation1 + $0x100] ss:$8 sm:$0xf]   ;;  %v3272_v26 = vpack.i.bf16 %v2622_v16, %v2611_v15 }
  0x51   :  { %v2524_v32 = vsel %vm2052_vm0, %v2522_v24, %v2520_v23  ;;  %v2086_v54 = vld [vmem:[#allocation1 + $0x100] ss:$8 sm:$0xf0]   ;;  %2055 = vst.msk [vmem:[#allocation0] sm:$0xff] %vm2054_vm1, %v2053_v52   ;;  %v3277_v23 = vpack.i.bf16 %v2644_v5, %v2633_v4 }
  0x52   :  { %v3252_v42 = vpack.i.bf16 %v2535_v33, %v2524_v32  ;;  %v2088_v55 = vsel %vm2052_vm0, %v2086_v54, %v2084_v53  ;;  %v2057_v56 = vld [vmem:[#allocation1 + $0x40] ss:$8 sm:$0xf]   ;;  %3258 = vrot.lane.b32.xlu0 %v3257_v37, %s3299_s23  ;;  %v2673_v59 = vld [vmem:[#allocation1 + $0xc1] ss:$8 sm:$0xf]  }
  0x53   :  { %v2059_v57 = vld [vmem:[#allocation1 + $0x40] ss:$8 sm:$0xf0]   ;;  %v2675_v60 = vld [vmem:[#allocation1 + $0xc1] ss:$8 sm:$0xf0]  }
  0x54   :  { %v2684_v61 = vld [vmem:[#allocation1 + $0x1c1] ss:$8 sm:$0xf]   ;;  %2091 = vst.msk [vmem:[#allocation0 + $0x20] sm:$0xff] %vm2054_vm1, %v2088_v55   ;;  %v2061_v63 = vsel %vm2052_vm0, %v2059_v57, %v2057_v56  ;;  %3253 = vrot.lane.b32.xlu1 %v3252_v42, %s3298_s0  ;;  %v2677_v20 = vsel %vm2052_vm0, %v2675_v60, %v2673_v59 }
  0x55   :  { %v2686_v62 = vld [vmem:[#allocation1 + $0x1c1] ss:$8 sm:$0xf0]   ;;  %v2093_v0 = vld [vmem:[#allocation1 + $0x140] ss:$8 sm:$0xf]  }
  0x56   :  { %v2095_v1 = vld [vmem:[#allocation1 + $0x140] ss:$8 sm:$0xf0]   ;;  %v2651_v6 = vld [vmem:[#allocation1 + $0x281] ss:$8 sm:$0xf]   ;;  %3268 = vrot.lane.b32.xlu0 %v3267_v58, %s3299_s23  ;;  %v2688_v27 = vsel %vm2052_vm0, %v2686_v62, %v2684_v61 }
  0x57   :  { %v2653_v7 = vld [vmem:[#allocation1 + $0x281] ss:$8 sm:$0xf0]   ;;  %2064 = vst.msk [vmem:[#allocation0 + $0x8] sm:$0xff] %vm2054_vm1, %v2061_v63   ;;  %v2097_v10 = vsel %vm2052_vm0, %v2095_v1, %v2093_v0  ;;  %v3287_v42 = vpack.i.bf16 %v2688_v27, %v2677_v20 }
  0x58   :  { %v2662_v8 = vld [vmem:[#allocation1 + $0x381] ss:$8 sm:$0xf]   ;;  %v2120_v12 = vld [vmem:[#allocation1 + $0x200] ss:$8 sm:$0xf]   ;;  %3263 = vrot.lane.b32.xlu1 %v3262_v3, %s3299_s23  ;;  %v2655_v35 = vsel %vm2052_vm0, %v2653_v7, %v2651_v6 }
  0x59   :  { %v2664_v9 = vld [vmem:[#allocation1 + $0x381] ss:$8 sm:$0xf0]   ;;  %v2122_v14 = vld [vmem:[#allocation1 + $0x200] ss:$8 sm:$0xf0]  }
  0x5a   :  { %2100 = vst.msk [vmem:[#allocation0 + $0x28] sm:$0xff] %vm2054_vm1, %v2097_v10   ;;  %v2124_v17 = vsel %vm2052_vm0, %v2122_v14, %v2120_v12  ;;  %v2156_v18 = vld [vmem:[#allocation1 + $0x300] ss:$8 sm:$0xf]   ;;  %v2666_v36 = vsel %vm2052_vm0, %v2664_v9, %v2662_v8  ;;  %3278 = vrot.lane.b32.xlu0 %v3277_v23, %s3299_s23 }
  0x5b   :  { %v2158_v19 = vld [vmem:[#allocation1 + $0x300] ss:$8 sm:$0xf0]   ;;  %2127 = vst.msk [vmem:[#allocation0 + $0x40] sm:$0xff] %vm2054_vm1, %v2124_v17   ;;  %v3282_v46 = vpack.i.bf16 %v2666_v36, %v2655_v35 }
  0x5c   :  { %v2160_v13 = vsel %vm2052_vm0, %v2158_v19, %v2156_v18  ;;  %v2129_v21 = vld [vmem:[#allocation1 + $0x240] ss:$8 sm:$0xf]   ;;  %v2695_v28 = vld [vmem:[#allocation1 + $0x2c1] ss:$8 sm:$0xf]   ;;  %3273 = vrot.lane.b32.xlu1 %v3272_v26, %s3299_s23 }
  0x5d   :  { %v2131_v22 = vld [vmem:[#allocation1 + $0x240] ss:$8 sm:$0xf0]   ;;  %2163 = vst.msk [vmem:[#allocation0 + $0x60] sm:$0xff] %vm2054_vm1, %v2160_v13  }
  0x5e   :  { %v2133_v24 = vsel %vm2052_vm0, %v2131_v22, %v2129_v21  ;;  %v2165_v25 = vld [vmem:[#allocation1 + $0x340] ss:$8 sm:$0xf]   ;;  %v2697_v29 = vld [vmem:[#allocation1 + $0x2c1] ss:$8 sm:$0xf0]   ;;  %3288 = vrot.lane.b32.xlu0 %v3287_v42, %s3299_s23 }
  0x5f   :  { %v2167_v2 = vld [vmem:[#allocation1 + $0x340] ss:$8 sm:$0xf0]   ;;  %v2706_v30 = vld [vmem:[#allocation1 + $0x3c1] ss:$8 sm:$0xf]   ;;  %v2699_v50 = vsel %vm2052_vm0, %v2697_v29, %v2695_v28 }
  0x60   :  { %v2708_v32 = vld [vmem:[#allocation1 + $0x3c1] ss:$8 sm:$0xf0]   ;;  %2136 = vst.msk [vmem:[#allocation0 + $0x48] sm:$0xff] %vm2054_vm1, %v2133_v24   ;;  %v2169_v33 = vsel %vm2052_vm0, %v2167_v2, %v2165_v25  ;;  %3283 = vrot.lane.b32.xlu1 %v3282_v46, %s3299_s23 }
  0x61   :  { %v2066_v11 = vld [vmem:[#allocation1 + $0x80] ss:$8 sm:$0xf]   ;;  %2172 = vst.msk [vmem:[#allocation0 + $0x68] sm:$0xff] %vm2054_vm1, %v2169_v33   ;;  %v2710_v51 = vsel %vm2052_vm0, %v2708_v32, %v2706_v30 }
  0x62   :  { %v2068_v34 = vld [vmem:[#allocation1 + $0x80] ss:$8 sm:$0xf0]   ;;  %v3292_v61 = vpack.i.bf16 %v2710_v51, %v2699_v50 }
  0x63   :  { %v2070_v37 = vsel %vm2052_vm0, %v2068_v34, %v2066_v11  ;;  %v2102_v38 = vld [vmem:[#allocation1 + $0x180] ss:$8 sm:$0xf]  }
  0x64   :  { %v2104_v39 = vld [vmem:[#allocation1 + $0x180] ss:$8 sm:$0xf0]   ;;  %2073 = vst.msk [vmem:[#allocation0 + $0x10] sm:$0xff] %vm2054_vm1, %v2070_v37   ;;  %3293 = vrot.lane.b32.xlu1 %v3292_v61, %s3299_s23 }
  0x65   :  { %v2106_v40 = vsel %vm2052_vm0, %v2104_v39, %v2102_v38  ;;  %v2138_v41 = vld [vmem:[#allocation1 + $0x280] ss:$8 sm:$0xf]  }
  0x66   :  { %v2140_v31 = vld [vmem:[#allocation1 + $0x280] ss:$8 sm:$0xf0]   ;;  %2109 = vst.msk [vmem:[#allocation0 + $0x30] sm:$0xff] %vm2054_vm1, %v2106_v40  }
  0x67   :  { %v2142_v43 = vsel %vm2052_vm0, %v2140_v31, %v2138_v41  ;;  %v2174_v44 = vld [vmem:[#allocation1 + $0x380] ss:$8 sm:$0xf]  }
  0x68   :  { %v2176_v45 = vld [vmem:[#allocation1 + $0x380] ss:$8 sm:$0xf0]   ;;  %2145 = vst.msk [vmem:[#allocation0 + $0x50] sm:$0xff] %vm2054_vm1, %v2142_v43  }
  0x69   :  { %v2178_v47 = vsel %vm2052_vm0, %v2176_v45, %v2174_v44  ;;  %v2075_v48 = vld [vmem:[#allocation1 + $0xc0] ss:$8 sm:$0xf]  }
  0x6a   :  { %v2077_v49 = vld [vmem:[#allocation1 + $0xc0] ss:$8 sm:$0xf0]   ;;  %2181 = vst.msk [vmem:[#allocation0 + $0x70] sm:$0xff] %vm2054_vm1, %v2178_v47  }
  0x6b   :  { %v2079_v52 = vsel %vm2052_vm0, %v2077_v49, %v2075_v48  ;;  %v2111_v53 = vld [vmem:[#allocation1 + $0x1c0] ss:$8 sm:$0xf]  }
  0x6c   :  { %v2113_v54 = vld [vmem:[#allocation1 + $0x1c0] ss:$8 sm:$0xf0]   ;;  %2082 = vst.msk [vmem:[#allocation0 + $0x18] sm:$0xff] %vm2054_vm1, %v2079_v52  }
  0x6d   :  { %v2115_v55 = vsel %vm2052_vm0, %v2113_v54, %v2111_v53  ;;  %v2147_v56 = vld [vmem:[#allocation1 + $0x2c0] ss:$8 sm:$0xf]  }
  0x6e   :  { %v2149_v57 = vld [vmem:[#allocation1 + $0x2c0] ss:$8 sm:$0xf0]   ;;  %2118 = vst.msk [vmem:[#allocation0 + $0x38] sm:$0xff] %vm2054_vm1, %v2115_v55  }
  0x6f   :  { %v2151_v58 = vsel %vm2052_vm0, %v2149_v57, %v2147_v56  ;;  %v2183_v59 = vld [vmem:[#allocation1 + $0x3c0] ss:$8 sm:$0xf]  }
  0x70   :  { %v2185_v60 = vld [vmem:[#allocation1 + $0x3c0] ss:$8 sm:$0xf0]   ;;  %2154 = vst.msk [vmem:[#allocation0 + $0x58] sm:$0xff] %vm2054_vm1, %v2151_v58  }
  0x71   :  { %v2187_v62 = vsel %vm2052_vm0, %v2185_v60, %v2183_v59 }
  0x72   :  { %2190 = vst.msk [vmem:[#allocation0 + $0x78] sm:$0xff] %vm2054_vm1, %v2187_v62  }
  0x87   :  { %v3179_v63 = vpop.permute.xlu0 %3178 }
  0x88   :  { %v3181_v0 = vunpack.i.h.bf16 %v3179_v63  ;;  %v3180_v1 = vunpack.i.l.bf16 %v3179_v63 }
  0x8a   :  { %2200 = vst.msk [vmem:[#allocation0] sm:$0xff] %vm2199_vm2, %v3180_v1   ;;  %2211 = vst.msk [vmem:[#allocation0 + $0x20] sm:$0xff] %vm2199_vm2, %v3181_v0  }
  0x8e   :  { %v3189_v3 = vpop.permute.xlu1 %3188 }
  0x8f   :  { %v3191_v4 = vunpack.i.h.bf16 %v3189_v3  ;;  %v3190_v5 = vunpack.i.l.bf16 %v3189_v3 }
  0x91   :  { %2244 = vst.msk [vmem:[#allocation0 + $0x8] sm:$0xff] %vm2199_vm2, %v3190_v5   ;;  %2255 = vst.msk [vmem:[#allocation0 + $0x28] sm:$0xff] %vm2199_vm2, %v3191_v4  }
  0x94   :  { %v3184_v6 = vpop.permute.xlu0 %3183 }
  0x95   :  { %v3186_v7 = vunpack.i.h.bf16 %v3184_v6  ;;  %v3185_v8 = vunpack.i.l.bf16 %v3184_v6 }
  0x97   :  { %2222 = vst.msk [vmem:[#allocation0 + $0x40] sm:$0xff] %vm2199_vm2, %v3185_v8   ;;  %2233 = vst.msk [vmem:[#allocation0 + $0x60] sm:$0xff] %vm2199_vm2, %v3186_v7  }
  0x99   :  { %v3194_v9 = vpop.permute.xlu1 %3193 }
  0x9a   :  { %v3196_v10 = vunpack.i.h.bf16 %v3194_v9  ;;  %v3195_v12 = vunpack.i.l.bf16 %v3194_v9 }
  0x9c   :  { %2266 = vst.msk [vmem:[#allocation0 + $0x48] sm:$0xff] %vm2199_vm2, %v3195_v12   ;;  %2277 = vst.msk [vmem:[#allocation0 + $0x68] sm:$0xff] %vm2199_vm2, %v3196_v10  }
  0x9f   :  { %v3199_v14 = vpop.permute.xlu0 %3198 }
  0xa0   :  { %v3201_v15 = vunpack.i.h.bf16 %v3199_v14  ;;  %v3200_v16 = vunpack.i.l.bf16 %v3199_v14 }
  0xa2   :  { %2299 = vst.msk [vmem:[#allocation0 + $0x30] sm:$0xff] %vm2199_vm2, %v3201_v15   ;;  %2288 = vst.msk [vmem:[#allocation0 + $0x10] sm:$0xff] %vm2199_vm2, %v3200_v16  }
  0xa4   :  { %v3204_v17 = vpop.permute.xlu1 %3203 }
  0xa5   :  { %v3206_v18 = vunpack.i.h.bf16 %v3204_v17  ;;  %v3205_v19 = vunpack.i.l.bf16 %v3204_v17 }
  0xa7   :  { %2310 = vst.msk [vmem:[#allocation0 + $0x50] sm:$0xff] %vm2199_vm2, %v3205_v19   ;;  %2321 = vst.msk [vmem:[#allocation0 + $0x70] sm:$0xff] %vm2199_vm2, %v3206_v18  }
  0xab   :  { %v3209_v13 = vpop.permute.xlu0 %3208 }
  0xac   :  { %v3211_v21 = vunpack.i.h.bf16 %v3209_v13  ;;  %v3210_v22 = vunpack.i.l.bf16 %v3209_v13 }
  0xae   :  { %2343 = vst.msk [vmem:[#allocation0 + $0x38] sm:$0xff] %vm2199_vm2, %v3211_v21   ;;  %2332 = vst.msk [vmem:[#allocation0 + $0x18] sm:$0xff] %vm2199_vm2, %v3210_v22  }
  0xaf   :  { %v3219_v23 = vpop.permute.xlu0 %3218 }
  0xb0   :  { %v3214_v24 = vpop.permute.xlu1 %3213  ;;  %v3221_v25 = vunpack.i.h.bf16 %v3219_v23  ;;  %v3220_v2 = vunpack.i.l.bf16 %v3219_v23 }
  0xb1   :  { %v3216_v26 = vunpack.i.h.bf16 %v3214_v24  ;;  %v3215_v20 = vunpack.i.l.bf16 %v3214_v24 }
  0xb2   :  { %2386 = vst.msk [vmem:[#allocation0 + $0x20] sm:$0xff] %vm2374_vm3, %v3221_v25   ;;  %2375 = vst.msk [vmem:[#allocation0] sm:$0xff] %vm2374_vm3, %v3220_v2  }
  0xb3   :  { %2354 = vst.msk [vmem:[#allocation0 + $0x58] sm:$0xff] %vm2199_vm2, %v3215_v20   ;;  %2365 = vst.msk [vmem:[#allocation0 + $0x78] sm:$0xff] %vm2199_vm2, %v3216_v26   ;;  %v3229_v27 = vpop.permute.xlu0 %3228 }
  0xb4   :  { %v3224_v28 = vpop.permute.xlu1 %3223  ;;  %v3231_v29 = vunpack.i.h.bf16 %v3229_v27  ;;  %v3230_v30 = vunpack.i.l.bf16 %v3229_v27 }
  0xb5   :  { %v3226_v32 = vunpack.i.h.bf16 %v3224_v28  ;;  %v3225_v33 = vunpack.i.l.bf16 %v3224_v28 }
  0xb6   :  { %2430 = vst.msk [vmem:[#allocation0 + $0x28] sm:$0xff] %vm2374_vm3, %v3231_v29   ;;  %2419 = vst.msk [vmem:[#allocation0 + $0x8] sm:$0xff] %vm2374_vm3, %v3230_v30  }
  0xb7   :  { %2408 = vst.msk [vmem:[#allocation0 + $0x60] sm:$0xff] %vm2374_vm3, %v3226_v32   ;;  %2397 = vst.msk [vmem:[#allocation0 + $0x40] sm:$0xff] %vm2374_vm3, %v3225_v33  }
  0xb8   :  { %v3239_v11 = vpop.permute.xlu0 %3238 }
  0xb9   :  { %v3241_v35 = vunpack.i.h.bf16 %v3239_v11  ;;  %v3240_v36 = vunpack.i.l.bf16 %v3239_v11 }
  0xba   :  { %v3234_v34 = vpop.permute.xlu1 %3233 }
  0xbb   :  { %v3236_v37 = vunpack.i.h.bf16 %v3234_v34  ;;  %v3235_v38 = vunpack.i.l.bf16 %v3234_v34  ;;  %2463 = vst.msk [vmem:[#allocation0 + $0x10] sm:$0xff] %vm2374_vm3, %v3240_v36   ;;  %2474 = vst.msk [vmem:[#allocation0 + $0x30] sm:$0xff] %vm2374_vm3, %v3241_v35  }
  0xbd   :  { %2452 = vst.msk [vmem:[#allocation0 + $0x68] sm:$0xff] %vm2374_vm3, %v3236_v37   ;;  %2441 = vst.msk [vmem:[#allocation0 + $0x48] sm:$0xff] %vm2374_vm3, %v3235_v38  }
  0xc0   :  { %v3249_v39 = vpop.permute.xlu0 %3248 }
  0xc1   :  { %v3251_v41 = vunpack.i.h.bf16 %v3249_v39  ;;  %v3250_v31 = vunpack.i.l.bf16 %v3249_v39 }
  0xc2   :  { %v3244_v40 = vpop.permute.xlu1 %3243 }
  0xc3   :  { %v3246_v42 = vunpack.i.h.bf16 %v3244_v40  ;;  %v3245_v43 = vunpack.i.l.bf16 %v3244_v40  ;;  %2507 = vst.msk [vmem:[#allocation0 + $0x18] sm:$0xff] %vm2374_vm3, %v3250_v31   ;;  %2518 = vst.msk [vmem:[#allocation0 + $0x38] sm:$0xff] %vm2374_vm3, %v3251_v41  }
  0xc4   :  { %v3259_v44 = vpop.permute.xlu0 %3258 }
  0xc5   :  { %2496 = vst.msk [vmem:[#allocation0 + $0x70] sm:$0xff] %vm2374_vm3, %v3246_v42   ;;  %2485 = vst.msk [vmem:[#allocation0 + $0x50] sm:$0xff] %vm2374_vm3, %v3245_v43   ;;  %v3261_v46 = vunpack.i.h.bf16 %v3259_v44  ;;  %v3260_v47 = vunpack.i.l.bf16 %v3259_v44 }
  0xc6   :  { %v3254_v45 = vpop.permute.xlu1 %3253 }
  0xc7   :  { %v3256_v48 = vunpack.i.h.bf16 %v3254_v45  ;;  %v3255_v49 = vunpack.i.l.bf16 %v3254_v45  ;;  %2550 = vst.msk [vmem:[#allocation0] sm:$0xff] %vm2549_vm4, %v3260_v47   ;;  %2561 = vst.msk [vmem:[#allocation0 + $0x20] sm:$0xff] %vm2549_vm4, %v3261_v46  }
  0xc8   :  { %v3269_v50 = vpop.permute.xlu0 %3268 }
  0xc9   :  { %2529 = vst.msk [vmem:[#allocation0 + $0x58] sm:$0xff] %vm2374_vm3, %v3255_v49   ;;  %2540 = vst.msk [vmem:[#allocation0 + $0x78] sm:$0xff] %vm2374_vm3, %v3256_v48   ;;  %v3271_v52 = vunpack.i.h.bf16 %v3269_v50  ;;  %v3270_v53 = vunpack.i.l.bf16 %v3269_v50 }
  0xca   :  { %v3264_v51 = vpop.permute.xlu1 %3263 }
  0xcb   :  { %v3266_v54 = vunpack.i.h.bf16 %v3264_v51  ;;  %v3265_v55 = vunpack.i.l.bf16 %v3264_v51  ;;  %2594 = vst.msk [vmem:[#allocation0 + $0x8] sm:$0xff] %vm2549_vm4, %v3270_v53   ;;  %2605 = vst.msk [vmem:[#allocation0 + $0x28] sm:$0xff] %vm2549_vm4, %v3271_v52  }
  0xcc   :  { %v3279_v56 = vpop.permute.xlu0 %3278 }
  0xcd   :  { %2572 = vst.msk [vmem:[#allocation0 + $0x40] sm:$0xff] %vm2549_vm4, %v3265_v55   ;;  %2583 = vst.msk [vmem:[#allocation0 + $0x60] sm:$0xff] %vm2549_vm4, %v3266_v54   ;;  %v3281_v58 = vunpack.i.h.bf16 %v3279_v56  ;;  %v3280_v59 = vunpack.i.l.bf16 %v3279_v56 }
  0xce   :  { %v3274_v57 = vpop.permute.xlu1 %3273  ;;  %v2721_v63 = vld [vmem:[#allocation0] sm:$0xff] }
  0xcf   :  { %v3276_v60 = vunpack.i.h.bf16 %v3274_v57  ;;  %v3275_v61 = vunpack.i.l.bf16 %v3274_v57  ;;  %2638 = vst.msk [vmem:[#allocation0 + $0x10] sm:$0xff] %vm2549_vm4, %v3280_v59   ;;  %2649 = vst.msk [vmem:[#allocation0 + $0x30] sm:$0xff] %vm2549_vm4, %v3281_v58   ;;  %v2750_v4 = vld [vmem:[#allocation0 + $0x20] sm:$0xff] }
  0xd0   :  { %v3289_v62 = vpop.permute.xlu0 %3288 }
  0xd1   :  { %2616 = vst.msk [vmem:[#allocation0 + $0x48] sm:$0xff] %vm2549_vm4, %v3275_v61   ;;  %2627 = vst.msk [vmem:[#allocation0 + $0x68] sm:$0xff] %vm2549_vm4, %v3276_v60   ;;  %v3291_v1 = vunpack.i.h.bf16 %v3289_v62  ;;  %v3290_v3 = vunpack.i.l.bf16 %v3289_v62 }
  0xd2   :  { %v3284_v0 = vpop.permute.xlu1 %3283  ;;  %v2727_v5 = vld [vmem:[#allocation0 + $0x8] sm:$0xff] }
  0xd3   :  { %v2758_v6 = vld [vmem:[#allocation0 + $0x28] sm:$0xff]  ;;  %v3286_v7 = vunpack.i.h.bf16 %v3284_v0  ;;  %v3285_v8 = vunpack.i.l.bf16 %v3284_v0  ;;  %v3130_v9 = vpack.c.bf16 %v2727_v5, %v2721_v63  ;;  %2682 = vst.msk [vmem:[#allocation0 + $0x18] sm:$0xff] %vm2549_vm4, %v3290_v3   ;;  %2693 = vst.msk [vmem:[#allocation0 + $0x38] sm:$0xff] %vm2549_vm4, %v3291_v1  }
  0xd4   :  { %v3140_v10 = vpack.c.bf16 %v2758_v6, %v2750_v4  ;;  %v2782_v14 = vld [vmem:[#allocation0 + $0x40] sm:$0xff] }
  0xd5   :  { %2660 = vst.msk [vmem:[#allocation0 + $0x50] sm:$0xff] %vm2549_vm4, %v3285_v8   ;;  %2671 = vst.msk [vmem:[#allocation0 + $0x70] sm:$0xff] %vm2549_vm4, %v3286_v7   ;;  %v2814_v17 = vld [vmem:[#allocation0 + $0x60] sm:$0xff] }
  0xd6   :  { %3131 = vst [vmem:[%s3638_s1] sm:$0xff] %v3130_v9   ;;  %3168 = vst [vmem:[%s3638_s1 + $0x10] sm:$0xff] %v3140_v10   ;;  %v3294_v12 = vpop.permute.xlu1 %3293  ;;  %v2734_v22 = vld [vmem:[#allocation0 + $0x10] sm:$0xff] }
  0xd7   :  { %v3296_v15 = vunpack.i.h.bf16 %v3294_v12  ;;  %v3295_v16 = vunpack.i.l.bf16 %v3294_v12  ;;  %v2766_v23 = vld [vmem:[#allocation0 + $0x30] sm:$0xff] }
  0xd8   :  { %v2790_v18 = vld [vmem:[#allocation0 + $0x48] sm:$0xff] }
  0xd9   :  { %v2822_v19 = vld [vmem:[#allocation0 + $0x68] sm:$0xff]  ;;  %v3150_v13 = vpack.c.bf16 %v2790_v18, %v2782_v14  ;;  %2704 = vst.msk [vmem:[#allocation0 + $0x58] sm:$0xff] %vm2549_vm4, %v3295_v16   ;;  %2715 = vst.msk [vmem:[#allocation0 + $0x78] sm:$0xff] %vm2549_vm4, %v3296_v15  }
  0xda   :  { %v3160_v21 = vpack.c.bf16 %v2822_v19, %v2814_v17  ;;  %v2742_v24 = vld [vmem:[#allocation0 + $0x18] sm:$0xff] }
  0xdb   :  { %3170 = vst [vmem:[%s3638_s1 + $0x20] sm:$0xff] %v3150_v13   ;;  %v2774_v25 = vld [vmem:[#allocation0 + $0x38] sm:$0xff]  ;;  %v3135_v2 = vpack.c.bf16 %v2742_v24, %v2734_v22 }
  0xdc   :  { %3172 = vst [vmem:[%s3638_s1 + $0x30] sm:$0xff] %v3160_v21   ;;  %v3145_v26 = vpack.c.bf16 %v2774_v25, %v2766_v23  ;;  %v2798_v20 = vld [vmem:[#allocation0 + $0x50] sm:$0xff] }
  0xdd   :  { %3167 = vst [vmem:[%s3638_s1 + $0x8] sm:$0xff] %v3135_v2   ;;  %v2830_v27 = vld [vmem:[#allocation0 + $0x70] sm:$0xff] }
  0xde   :  { %3169 = vst [vmem:[%s3638_s1 + $0x18] sm:$0xff] %v3145_v26  }
  0xe0   :  { %v2806_v28 = vld [vmem:[#allocation0 + $0x58] sm:$0xff] }
  0xe1   :  { %v2838_v29 = vld [vmem:[#allocation0 + $0x78] sm:$0xff]  ;;  %v3155_v30 = vpack.c.bf16 %v2806_v28, %v2798_v20 }
  0xe2   :  { %v3165_v32 = vpack.c.bf16 %v2838_v29, %v2830_v27 }
  0xe3   :  { %3171 = vst [vmem:[%s3638_s1 + $0x28] sm:$0xff] %v3155_v30  }
  0xe4   :  { %3173 = vst [vmem:[%s3638_s1 + $0x38] sm:$0xff] %v3165_v32  }

</bundles_post_ra>
